<compile_context>
chip_gen: v5e
topology: v5e:2x2
jax: 0.10.0
libtpu: 0.0.40
codegen_flags: <defaults>
</compile_context>

<pallas_src>
import functools

import jax
import jax.numpy as jnp
from jax.experimental import pallas as pl
from jax.experimental.pallas import tpu as pltpu


def _cbam_kernel(W, K, x_ref, w1_ref, w2_ref, mw_ref, o_ref):
    """x_ref/o_ref: (B, C, HW); w1: (hidden, C); w2: (C, hidden);
    mw_ref: (K*K, 8, HW) masked 7x7 taps, [avg,max] row pair tiled 4x (f32)."""
    B, C, HW = x_ref.shape
    P = K // 2

    w1 = w1_ref[...]                                     # (hidden, C) f32
    w2 = w2_ref[...]                                     # (C, hidden) f32

    # ---------------- Channel attention (batched over the block) -----------
    avg_cols, max_cols = [], []
    for b in range(B):                                   # static unroll (small B)
        xb = x_ref[b].astype(jnp.float32)                # (C, HW)
        avg_cols.append(jnp.mean(xb, axis=1, keepdims=True))   # (C, 1)
        max_cols.append(jnp.max(xb, axis=1, keepdims=True))    # (C, 1)
    pooled = jnp.concatenate(avg_cols + max_cols, axis=1)      # (C, 2B) [avgs|maxes]
    h = jnp.maximum(jnp.dot(w1, pooled, preferred_element_type=jnp.float32), 0.0)
    logits = jnp.dot(w2, h, preferred_element_type=jnp.float32)     # (C, 2B)
    ca = jax.nn.sigmoid(logits[:, :B] + logits[:, B:])              # (C, B)

    # ---------------- Spatial attention: 4 samples per (8, HW) tile --------
    n_groups = (B + 3) // 4
    for g in range(n_groups):
        nb = min(4, B - 4 * g)
        S = 2 * nb                                        # rows used in this group
        rows = []
        for i in range(nb):
            b = 4 * g + i
            xca = x_ref[b].astype(jnp.float32) * ca[:, b:b + 1]     # (C, HW)
            rows.append(jnp.mean(xca, axis=0, keepdims=True))       # (1, HW)
            rows.append(jnp.max(xca, axis=0, keepdims=True))        # (1, HW)
        m = jnp.concatenate(rows, axis=0)                 # (S, HW) [a0,m0,a1,m1,..]

        # 7x7 conv over the flattened HW axis: one circular lane-roll per tap;
        # edge handling + per-channel weight pre-folded into mw_ref[t].
        naccs = 4                                         # break serial FMA chain
        accs = [jnp.zeros((S, HW), jnp.float32) for _ in range(naccs)]
        for ky in range(K):
            for kx in range(K):
                t = ky * K + kx
                shift = (ky - P) * W + (kx - P)           # shift in flattened HW
                sh = m if shift == 0 else pltpu.roll(m, (-shift) % HW, axis=1)
                accs[t % naccs] = accs[t % naccs] + sh * mw_ref[t, :S, :]
        acc = (accs[0] + accs[1]) + (accs[2] + accs[3])   # (S, HW)

        for i in range(nb):
            b = 4 * g + i
            sa = jax.nn.sigmoid(acc[2 * i:2 * i + 1, :]
                                + acc[2 * i + 1:2 * i + 2, :])       # (1, HW)
            xca = x_ref[b].astype(jnp.float32) * ca[:, b:b + 1]
            o_ref[b] = (xca * sa).astype(o_ref.dtype)


def cbam_pallas(x_nchw, w1, w2, w_sa, *, kernel_size=7, batch_block=None):
    """x_nchw: (N, C, H, W); w1: (hidden, C); w2: (C, hidden); w_sa: (1, 2, K, K)."""
    N, C, H, W = x_nchw.shape
    HW = H * W
    K = kernel_size
    P = K // 2
    KK = K * K
    hidden = w1.shape[0]
    assert w_sa.shape == (1, 2, K, K)

    x2 = x_nchw.reshape(N, C, HW)                         # NCHW -> (N,C,HW): pure reshape

    # Host-precomputed masked taps: mw[t, c, p] = w_sa[0,c,ky,kx]*valid(p,ky,kx),
    # then the [avg,max] row pair is tiled 4x -> (K*K, 8, HW) (dense, no padding).
    row_i = jnp.arange(HW, dtype=jnp.int32) // W
    col_i = jnp.arange(HW, dtype=jnp.int32) % W
    sy = jnp.arange(K, dtype=jnp.int32) - P
    sx = jnp.arange(K, dtype=jnp.int32) - P
    valid = ((row_i[None, None, :] + sy[:, None, None] >= 0)
             & (row_i[None, None, :] + sy[:, None, None] < H)
             & (col_i[None, None, :] + sx[None, :, None] >= 0)
             & (col_i[None, None, :] + sx[None, :, None] < W))        # (K, K, HW)
    mw = (w_sa[0].astype(jnp.float32)[:, :, :, None]
          * valid[None].astype(jnp.float32))                          # (2, K, K, HW)
    mw = jnp.transpose(mw, (1, 2, 0, 3)).reshape(KK, 2, HW)           # (K*K, 2, HW)
    mw = jnp.tile(mw, (1, 4, 1))                                      # (K*K, 8, HW)

    # Batch blocking: prefer multiples of 4 (full sublane packing), keep >=2
    # (preferably even) grid steps for v7x dual-TC, cap ~4 MiB x+out per step.
    if batch_block is None:
        per_sample_io = 2 * C * HW * x2.dtype.itemsize
        cands = [c for c in (16, 8, 4, 2)
                 if N % c == 0 and N // c >= 2 and c * per_sample_io <= (4 << 20)]
        even = [c for c in cands if (N // c) % 2 == 0]
        batch_block = (even or cands or [1])[0]
    assert N % batch_block == 0, "batch_block must divide N"
    B = batch_block
    grid = (N // B,)

    def rup(v, m):
        return -(-v // m) * m

    # VMEM budget (includes sublane/lane padding; x/out/mw double-buffered).
    io_block = 2 * B * rup(C, 8) * rup(HW, 128) * x2.dtype.itemsize
    est = (2 * io_block
           + 2 * KK * 8 * rup(HW, 128) * 4
           + 2 * (rup(hidden, 8) * rup(C, 128) + rup(C, 8) * rup(hidden, 128)) * 4
           + (2 << 20))                                   # compiler-scratch headroom
    cparams = dict(dimension_semantics=("parallel",))
    if est > (32 << 20):                                  # only raise when needed
        try:
            phys = pltpu.get_tpu_info().vmem_capacity_bytes
        except Exception:                                 # pragma: no cover
            phys = 64 << 20                               # conservative (v7x-sized)
        cparams["vmem_limit_bytes"] = min(int(est), int(phys * 3) // 4)

    kern = functools.partial(_cbam_kernel, W, K)
    out2 = pl.pallas_call(
        kern,
        out_shape=jax.ShapeDtypeStruct((N, C, HW), x2.dtype),
        grid_spec=pltpu.PrefetchScalarGridSpec(
            num_scalar_prefetch=0,
            grid=grid,
            in_specs=[
                pl.BlockSpec((B, C, HW), lambda n: (n, 0, 0)),      # x
                pl.BlockSpec((hidden, C), lambda n: (0, 0)),        # fc1 weight
                pl.BlockSpec((C, hidden), lambda n: (0, 0)),        # fc2 weight
                pl.BlockSpec((KK, 8, HW), lambda n: (0, 0, 0)),     # masked 7x7 taps
            ],
            out_specs=pl.BlockSpec((B, C, HW), lambda n: (n, 0, 0)),
        ),
        compiler_params=pltpu.CompilerParams(**cparams),
    )(x2, w1.astype(jnp.float32), w2.astype(jnp.float32), mw)

    return out2.reshape(N, C, H, W)


def cbam_reference(x_nchw, w1, w2, w_sa):
    """Pure-JAX reference matching the PyTorch CBAM forward (NCHW, f32)."""
    x_nchw = x_nchw.astype(jnp.float32)
    avg = jnp.mean(x_nchw, axis=(2, 3))              # (N, C)
    mx = jnp.max(x_nchw, axis=(2, 3))                # (N, C)

    def mlp(v):
        h = jnp.maximum(v @ w1.T, 0.0)
        return h @ w2.T

    ca = jax.nn.sigmoid(mlp(avg) + mlp(mx))[:, :, None, None]
    x1 = x_nchw * ca
    avg_s = jnp.mean(x1, axis=1, keepdims=True)
    max_s = jnp.max(x1, axis=1, keepdims=True)
    cat = jnp.concatenate([avg_s, max_s], axis=1)    # (N, 2, H, W)
    pad = w_sa.shape[-1] // 2
    sa_logits = jax.lax.conv_general_dilated(
        cat, w_sa, window_strides=(1, 1), padding=((pad, pad), (pad, pad)),
        dimension_numbers=("NCHW", "OIHW", "NCHW"))
    sa = jax.nn.sigmoid(sa_logits)
    return x1 * sa


if __name__ == "__main__":
    key = jax.random.PRNGKey(0)
    N, C, H, W = 2, 32, 16, 16          # in_planes=32, ratio=16 -> hidden=2
    ratio, ksz = 16, 7
    hidden = C // ratio

    k1, k2, k3, k4 = jax.random.split(key, 4)
    x = jax.random.normal(k1, (N, C, H, W), jnp.float32)
    w1 = 0.2 * jax.random.normal(k2, (hidden, C), jnp.float32)          # fc1 (1x1)
    w2 = 0.2 * jax.random.normal(k3, (C, hidden), jnp.float32)          # fc2 (1x1)
    w_sa = 0.2 * jax.random.normal(k4, (1, 2, ksz, ksz), jnp.float32)   # 7x7 conv

    # --- f32 path (B=1 per step: partial sublane packing, 2 grid steps) ---
    out = jax.block_until_ready(cbam_pallas(x, w1, w2, w_sa, kernel_size=ksz))
    ref = jax.block_until_ready(cbam_reference(x, w1, w2, w_sa))
    assert out.shape == x.shape
    err = float(jnp.max(jnp.abs(out - ref)))
    assert jnp.allclose(out, ref, atol=1e-4, rtol=1e-4), err

    # --- batched path (B=4 per step: full (8, HW) sublane packing) ---
    xb = jax.random.normal(jax.random.PRNGKey(1), (8, C, H, W), jnp.float32)
    out_b = jax.block_until_ready(cbam_pallas(xb, w1, w2, w_sa, kernel_size=ksz))
    ref_b = cbam_reference(xb, w1, w2, w_sa)
    err_b = float(jnp.max(jnp.abs(out_b - ref_b)))
    assert jnp.allclose(out_b, ref_b, atol=1e-4, rtol=1e-4), err_b

    # --- bf16 I/O path (internal compute stays f32) ---
    x_bf = x.astype(jnp.bfloat16)
    out_bf = jax.block_until_ready(cbam_pallas(x_bf, w1, w2, w_sa, kernel_size=ksz))
    ref_bf = cbam_reference(x_bf.astype(jnp.float32), w1, w2, w_sa)
    err_bf = float(jnp.max(jnp.abs(out_bf.astype(jnp.float32) - ref_bf)))
    assert out_bf.dtype == jnp.bfloat16
    assert jnp.allclose(out_bf.astype(jnp.float32), ref_bf, atol=3e-2, rtol=3e-2), err_bf

    print("KERNEL_OK")
</pallas_src>

<mosaic_0001>
module attributes {stable_mosaic.version = 11 : i64} {
  func.func @_cbam_kernel(%arg0: i32, %arg1: memref<1x32x256xf32, #tpu.memory_space<vmem>>, %arg2: memref<2x32xf32, #tpu.memory_space<vmem>>, %arg3: memref<32x2xf32, #tpu.memory_space<vmem>>, %arg4: memref<49x8x256xf32, #tpu.memory_space<vmem>>, %arg5: memref<1x32x256xf32, #tpu.memory_space<vmem>>) attributes {dimension_semantics = [#tpu.dimension_semantics<parallel>], iteration_bounds = array<i64: 2>, scalar_prefetch = 0 : i64, scratch_operands = 0 : i64, tpu.core_type = #tpu.core_type<tc>, window_params = [{transform_indices = @transform_0, window_bounds = array<i64: 1, 32, 256>}, {pipeline_mode = #tpu.pipeline_mode<synchronous>, transform_indices = @transform_1, window_bounds = array<i64: 2, 32>}, {pipeline_mode = #tpu.pipeline_mode<synchronous>, transform_indices = @transform_2, window_bounds = array<i64: 32, 2>}, {pipeline_mode = #tpu.pipeline_mode<synchronous>, transform_indices = @transform_3, window_bounds = array<i64: 49, 8, 256>}, {transform_indices = @transform_4, window_bounds = array<i64: 1, 32, 256>}]} {
    %c0 = arith.constant 0 : index
    %c0_0 = arith.constant 0 : index
    %0 = vector.load %arg2[%c0, %c0_0] : memref<2x32xf32, #tpu.memory_space<vmem>>, vector<2x32xf32>
    %c0_1 = arith.constant 0 : index
    %c0_2 = arith.constant 0 : index
    %1 = vector.load %arg3[%c0_1, %c0_2] : memref<32x2xf32, #tpu.memory_space<vmem>>, vector<32x2xf32>
    %c0_3 = arith.constant 0 : index
    %c0_4 = arith.constant 0 : index
    %c0_5 = arith.constant 0 : index
    %2 = vector.load %arg1[%c0_3, %c0_4, %c0_5] : memref<1x32x256xf32, #tpu.memory_space<vmem>>, vector<1x32x256xf32>
    %3 = vector.shape_cast %2 : vector<1x32x256xf32> to vector<32x256xf32>
    %cst = arith.constant dense<0.000000e+00> : vector<32xf32>
    %4 = vector.multi_reduction <add>, %3, %cst [1] : vector<32x256xf32> to vector<32xf32>
    %5 = vector.shape_cast %4 : vector<32xf32> to vector<32x1xf32>
    %cst_6 = arith.constant 2.560000e+02 : f32
    %6 = vector.broadcast %cst_6 : f32 to vector<32x1xf32>
    %7 = arith.divf %5, %6 : vector<32x1xf32>
    %cst_7 = arith.constant dense<0xFF800000> : vector<32xf32>
    %8 = vector.multi_reduction <maximumf>, %3, %cst_7 [1] : vector<32x256xf32> to vector<32xf32>
    %9 = vector.shape_cast %8 : vector<32xf32> to vector<32x1xf32>
    %10 = tpu.concatenate %7, %9 in 1 : vector<32x1xf32>, vector<32x1xf32> -> vector<32x2xf32>
    %cst_8 = arith.constant dense<0.000000e+00> : vector<2x2xf32>
    %11 = tpu.matmul %0, %10, %cst_8 {dimension_numbers = #tpu.dot_dimension_numbers<[1], [0], [0], [1], [0, 0, 1, 1], [], []>} : vector<2x32xf32>, vector<32x2xf32>, vector<2x2xf32> -> vector<2x2xf32>
    %cst_9 = arith.constant 0.000000e+00 : f32
    %12 = vector.broadcast %cst_9 : f32 to vector<2x2xf32>
    %13 = arith.maximumf %11, %12 : vector<2x2xf32>
    %cst_10 = arith.constant dense<0.000000e+00> : vector<32x2xf32>
    %14 = tpu.matmul %1, %13, %cst_10 {dimension_numbers = #tpu.dot_dimension_numbers<[1], [0], [0], [1], [0, 0, 1, 1], [], []>} : vector<32x2xf32>, vector<2x2xf32>, vector<32x2xf32> -> vector<32x2xf32>
    %15 = vector.extract_strided_slice %14 {offsets = [0, 0], sizes = [32, 1], strides = [1, 1]} : vector<32x2xf32> to vector<32x1xf32>
    %16 = vector.extract_strided_slice %14 {offsets = [0, 1], sizes = [32, 1], strides = [1, 1]} : vector<32x2xf32> to vector<32x1xf32>
    %17 = arith.addf %15, %16 : vector<32x1xf32>
    %18 = arith.negf %17 : vector<32x1xf32>
    %19 = math.exp %18 : vector<32x1xf32>
    %cst_11 = arith.constant 1.000000e+00 : f32
    %20 = vector.broadcast %cst_11 : f32 to vector<32x1xf32>
    %21 = arith.addf %20, %19 : vector<32x1xf32>
    %22 = arith.divf %20, %21 : vector<32x1xf32>
    %c0_12 = arith.constant 0 : index
    %c0_13 = arith.constant 0 : index
    %c0_14 = arith.constant 0 : index
    %23 = vector.load %arg1[%c0_12, %c0_13, %c0_14] : memref<1x32x256xf32, #tpu.memory_space<vmem>>, vector<1x32x256xf32>
    %24 = vector.shape_cast %23 : vector<1x32x256xf32> to vector<32x256xf32>
    %25 = vector.broadcast %22 : vector<32x1xf32> to vector<32x256xf32>
    %26 = arith.mulf %24, %25 : vector<32x256xf32>
    %cst_15 = arith.constant dense<0.000000e+00> : vector<256xf32>
    %27 = vector.multi_reduction <add>, %26, %cst_15 [0] : vector<32x256xf32> to vector<256xf32>
    %28 = vector.shape_cast %27 : vector<256xf32> to vector<1x256xf32>
    %cst_16 = arith.constant 3.200000e+01 : f32
    %29 = vector.broadcast %cst_16 : f32 to vector<1x256xf32>
    %30 = arith.divf %28, %29 : vector<1x256xf32>
    %cst_17 = arith.constant dense<0xFF800000> : vector<256xf32>
    %31 = vector.multi_reduction <maximumf>, %26, %cst_17 [0] : vector<32x256xf32> to vector<256xf32>
    %32 = vector.shape_cast %31 : vector<256xf32> to vector<1x256xf32>
    %33 = tpu.concatenate %30, %32 in 0 : vector<1x256xf32>, vector<1x256xf32> -> vector<2x256xf32>
    %cst_18 = arith.constant 0.000000e+00 : f32
    %34 = vector.broadcast %cst_18 : f32 to vector<2x256xf32>
    %cst_19 = arith.constant 0.000000e+00 : f32
    %35 = vector.broadcast %cst_19 : f32 to vector<2x256xf32>
    %cst_20 = arith.constant 0.000000e+00 : f32
    %36 = vector.broadcast %cst_20 : f32 to vector<2x256xf32>
    %cst_21 = arith.constant 0.000000e+00 : f32
    %37 = vector.broadcast %cst_21 : f32 to vector<2x256xf32>
    %c51_i32 = arith.constant 51 : i32
    %38 = tpu.dynamic_rotate %33 by %c51_i32 dim 1 : vector<2x256xf32>, i32 -> vector<2x256xf32>
    %c0_22 = arith.constant 0 : index
    %c0_23 = arith.constant 0 : index
    %c0_24 = arith.constant 0 : index
    %39 = vector.load %arg4[%c0_22, %c0_23, %c0_24] : memref<49x8x256xf32, #tpu.memory_space<vmem>>, vector<1x2x256xf32>
    %40 = vector.shape_cast %39 : vector<1x2x256xf32> to vector<2x256xf32>
    %41 = arith.mulf %38, %40 : vector<2x256xf32>
    %42 = arith.addf %34, %41 : vector<2x256xf32>
    %c50_i32 = arith.constant 50 : i32
    %43 = tpu.dynamic_rotate %33 by %c50_i32 dim 1 : vector<2x256xf32>, i32 -> vector<2x256xf32>
    %c1 = arith.constant 1 : index
    %c0_25 = arith.constant 0 : index
    %c0_26 = arith.constant 0 : index
    %44 = vector.load %arg4[%c1, %c0_25, %c0_26] : memref<49x8x256xf32, #tpu.memory_space<vmem>>, vector<1x2x256xf32>
    %45 = vector.shape_cast %44 : vector<1x2x256xf32> to vector<2x256xf32>
    %46 = arith.mulf %43, %45 : vector<2x256xf32>
    %47 = arith.addf %35, %46 : vector<2x256xf32>
    %c49_i32 = arith.constant 49 : i32
    %48 = tpu.dynamic_rotate %33 by %c49_i32 dim 1 : vector<2x256xf32>, i32 -> vector<2x256xf32>
    %c2 = arith.constant 2 : index
    %c0_27 = arith.constant 0 : index
    %c0_28 = arith.constant 0 : index
    %49 = vector.load %arg4[%c2, %c0_27, %c0_28] : memref<49x8x256xf32, #tpu.memory_space<vmem>>, vector<1x2x256xf32>
    %50 = vector.shape_cast %49 : vector<1x2x256xf32> to vector<2x256xf32>
    %51 = arith.mulf %48, %50 : vector<2x256xf32>
    %52 = arith.addf %36, %51 : vector<2x256xf32>
    %c48_i32 = arith.constant 48 : i32
    %53 = tpu.dynamic_rotate %33 by %c48_i32 dim 1 : vector<2x256xf32>, i32 -> vector<2x256xf32>
    %c3 = arith.constant 3 : index
    %c0_29 = arith.constant 0 : index
    %c0_30 = arith.constant 0 : index
    %54 = vector.load %arg4[%c3, %c0_29, %c0_30] : memref<49x8x256xf32, #tpu.memory_space<vmem>>, vector<1x2x256xf32>
    %55 = vector.shape_cast %54 : vector<1x2x256xf32> to vector<2x256xf32>
    %56 = arith.mulf %53, %55 : vector<2x256xf32>
    %57 = arith.addf %37, %56 : vector<2x256xf32>
    %c47_i32 = arith.constant 47 : i32
    %58 = tpu.dynamic_rotate %33 by %c47_i32 dim 1 : vector<2x256xf32>, i32 -> vector<2x256xf32>
    %c4 = arith.constant 4 : index
    %c0_31 = arith.constant 0 : index
    %c0_32 = arith.constant 0 : index
    %59 = vector.load %arg4[%c4, %c0_31, %c0_32] : memref<49x8x256xf32, #tpu.memory_space<vmem>>, vector<1x2x256xf32>
    %60 = vector.shape_cast %59 : vector<1x2x256xf32> to vector<2x256xf32>
    %61 = arith.mulf %58, %60 : vector<2x256xf32>
    %62 = arith.addf %42, %61 : vector<2x256xf32>
    %c46_i32 = arith.constant 46 : i32
    %63 = tpu.dynamic_rotate %33 by %c46_i32 dim 1 : vector<2x256xf32>, i32 -> vector<2x256xf32>
    %c5 = arith.constant 5 : index
    %c0_33 = arith.constant 0 : index
    %c0_34 = arith.constant 0 : index
    %64 = vector.load %arg4[%c5, %c0_33, %c0_34] : memref<49x8x256xf32, #tpu.memory_space<vmem>>, vector<1x2x256xf32>
    %65 = vector.shape_cast %64 : vector<1x2x256xf32> to vector<2x256xf32>
    %66 = arith.mulf %63, %65 : vector<2x256xf32>
    %67 = arith.addf %47, %66 : vector<2x256xf32>
    %c45_i32 = arith.constant 45 : i32
    %68 = tpu.dynamic_rotate %33 by %c45_i32 dim 1 : vector<2x256xf32>, i32 -> vector<2x256xf32>
    %c6 = arith.constant 6 : index
    %c0_35 = arith.constant 0 : index
    %c0_36 = arith.constant 0 : index
    %69 = vector.load %arg4[%c6, %c0_35, %c0_36] : memref<49x8x256xf32, #tpu.memory_space<vmem>>, vector<1x2x256xf32>
    %70 = vector.shape_cast %69 : vector<1x2x256xf32> to vector<2x256xf32>
    %71 = arith.mulf %68, %70 : vector<2x256xf32>
    %72 = arith.addf %52, %71 : vector<2x256xf32>
    %c35_i32 = arith.constant 35 : i32
    %73 = tpu.dynamic_rotate %33 by %c35_i32 dim 1 : vector<2x256xf32>, i32 -> vector<2x256xf32>
    %c7 = arith.constant 7 : index
    %c0_37 = arith.constant 0 : index
    %c0_38 = arith.constant 0 : index
    %74 = vector.load %arg4[%c7, %c0_37, %c0_38] : memref<49x8x256xf32, #tpu.memory_space<vmem>>, vector<1x2x256xf32>
    %75 = vector.shape_cast %74 : vector<1x2x256xf32> to vector<2x256xf32>
    %76 = arith.mulf %73, %75 : vector<2x256xf32>
    %77 = arith.addf %57, %76 : vector<2x256xf32>
    %c34_i32 = arith.constant 34 : i32
    %78 = tpu.dynamic_rotate %33 by %c34_i32 dim 1 : vector<2x256xf32>, i32 -> vector<2x256xf32>
    %c8 = arith.constant 8 : index
    %c0_39 = arith.constant 0 : index
    %c0_40 = arith.constant 0 : index
    %79 = vector.load %arg4[%c8, %c0_39, %c0_40] : memref<49x8x256xf32, #tpu.memory_space<vmem>>, vector<1x2x256xf32>
    %80 = vector.shape_cast %79 : vector<1x2x256xf32> to vector<2x256xf32>
    %81 = arith.mulf %78, %80 : vector<2x256xf32>
    %82 = arith.addf %62, %81 : vector<2x256xf32>
    %c33_i32 = arith.constant 33 : i32
    %83 = tpu.dynamic_rotate %33 by %c33_i32 dim 1 : vector<2x256xf32>, i32 -> vector<2x256xf32>
    %c9 = arith.constant 9 : index
    %c0_41 = arith.constant 0 : index
    %c0_42 = arith.constant 0 : index
    %84 = vector.load %arg4[%c9, %c0_41, %c0_42] : memref<49x8x256xf32, #tpu.memory_space<vmem>>, vector<1x2x256xf32>
    %85 = vector.shape_cast %84 : vector<1x2x256xf32> to vector<2x256xf32>
    %86 = arith.mulf %83, %85 : vector<2x256xf32>
    %87 = arith.addf %67, %86 : vector<2x256xf32>
    %c32_i32 = arith.constant 32 : i32
    %88 = tpu.dynamic_rotate %33 by %c32_i32 dim 1 : vector<2x256xf32>, i32 -> vector<2x256xf32>
    %c10 = arith.constant 10 : index
    %c0_43 = arith.constant 0 : index
    %c0_44 = arith.constant 0 : index
    %89 = vector.load %arg4[%c10, %c0_43, %c0_44] : memref<49x8x256xf32, #tpu.memory_space<vmem>>, vector<1x2x256xf32>
    %90 = vector.shape_cast %89 : vector<1x2x256xf32> to vector<2x256xf32>
    %91 = arith.mulf %88, %90 : vector<2x256xf32>
    %92 = arith.addf %72, %91 : vector<2x256xf32>
    %c31_i32 = arith.constant 31 : i32
    %93 = tpu.dynamic_rotate %33 by %c31_i32 dim 1 : vector<2x256xf32>, i32 -> vector<2x256xf32>
    %c11 = arith.constant 11 : index
    %c0_45 = arith.constant 0 : index
    %c0_46 = arith.constant 0 : index
    %94 = vector.load %arg4[%c11, %c0_45, %c0_46] : memref<49x8x256xf32, #tpu.memory_space<vmem>>, vector<1x2x256xf32>
    %95 = vector.shape_cast %94 : vector<1x2x256xf32> to vector<2x256xf32>
    %96 = arith.mulf %93, %95 : vector<2x256xf32>
    %97 = arith.addf %77, %96 : vector<2x256xf32>
    %c30_i32 = arith.constant 30 : i32
    %98 = tpu.dynamic_rotate %33 by %c30_i32 dim 1 : vector<2x256xf32>, i32 -> vector<2x256xf32>
    %c12 = arith.constant 12 : index
    %c0_47 = arith.constant 0 : index
    %c0_48 = arith.constant 0 : index
    %99 = vector.load %arg4[%c12, %c0_47, %c0_48] : memref<49x8x256xf32, #tpu.memory_space<vmem>>, vector<1x2x256xf32>
    %100 = vector.shape_cast %99 : vector<1x2x256xf32> to vector<2x256xf32>
    %101 = arith.mulf %98, %100 : vector<2x256xf32>
    %102 = arith.addf %82, %101 : vector<2x256xf32>
    %c29_i32 = arith.constant 29 : i32
    %103 = tpu.dynamic_rotate %33 by %c29_i32 dim 1 : vector<2x256xf32>, i32 -> vector<2x256xf32>
    %c13 = arith.constant 13 : index
    %c0_49 = arith.constant 0 : index
    %c0_50 = arith.constant 0 : index
    %104 = vector.load %arg4[%c13, %c0_49, %c0_50] : memref<49x8x256xf32, #tpu.memory_space<vmem>>, vector<1x2x256xf32>
    %105 = vector.shape_cast %104 : vector<1x2x256xf32> to vector<2x256xf32>
    %106 = arith.mulf %103, %105 : vector<2x256xf32>
    %107 = arith.addf %87, %106 : vector<2x256xf32>
    %c19_i32 = arith.constant 19 : i32
    %108 = tpu.dynamic_rotate %33 by %c19_i32 dim 1 : vector<2x256xf32>, i32 -> vector<2x256xf32>
    %c14 = arith.constant 14 : index
    %c0_51 = arith.constant 0 : index
    %c0_52 = arith.constant 0 : index
    %109 = vector.load %arg4[%c14, %c0_51, %c0_52] : memref<49x8x256xf32, #tpu.memory_space<vmem>>, vector<1x2x256xf32>
    %110 = vector.shape_cast %109 : vector<1x2x256xf32> to vector<2x256xf32>
    %111 = arith.mulf %108, %110 : vector<2x256xf32>
    %112 = arith.addf %92, %111 : vector<2x256xf32>
    %c18_i32 = arith.constant 18 : i32
    %113 = tpu.dynamic_rotate %33 by %c18_i32 dim 1 : vector<2x256xf32>, i32 -> vector<2x256xf32>
    %c15 = arith.constant 15 : index
    %c0_53 = arith.constant 0 : index
    %c0_54 = arith.constant 0 : index
    %114 = vector.load %arg4[%c15, %c0_53, %c0_54] : memref<49x8x256xf32, #tpu.memory_space<vmem>>, vector<1x2x256xf32>
    %115 = vector.shape_cast %114 : vector<1x2x256xf32> to vector<2x256xf32>
    %116 = arith.mulf %113, %115 : vector<2x256xf32>
    %117 = arith.addf %97, %116 : vector<2x256xf32>
    %c17_i32 = arith.constant 17 : i32
    %118 = tpu.dynamic_rotate %33 by %c17_i32 dim 1 : vector<2x256xf32>, i32 -> vector<2x256xf32>
    %c16 = arith.constant 16 : index
    %c0_55 = arith.constant 0 : index
    %c0_56 = arith.constant 0 : index
    %119 = vector.load %arg4[%c16, %c0_55, %c0_56] : memref<49x8x256xf32, #tpu.memory_space<vmem>>, vector<1x2x256xf32>
    %120 = vector.shape_cast %119 : vector<1x2x256xf32> to vector<2x256xf32>
    %121 = arith.mulf %118, %120 : vector<2x256xf32>
    %122 = arith.addf %102, %121 : vector<2x256xf32>
    %c16_i32 = arith.constant 16 : i32
    %123 = tpu.dynamic_rotate %33 by %c16_i32 dim 1 : vector<2x256xf32>, i32 -> vector<2x256xf32>
    %c17 = arith.constant 17 : index
    %c0_57 = arith.constant 0 : index
    %c0_58 = arith.constant 0 : index
    %124 = vector.load %arg4[%c17, %c0_57, %c0_58] : memref<49x8x256xf32, #tpu.memory_space<vmem>>, vector<1x2x256xf32>
    %125 = vector.shape_cast %124 : vector<1x2x256xf32> to vector<2x256xf32>
    %126 = arith.mulf %123, %125 : vector<2x256xf32>
    %127 = arith.addf %107, %126 : vector<2x256xf32>
    %c15_i32 = arith.constant 15 : i32
    %128 = tpu.dynamic_rotate %33 by %c15_i32 dim 1 : vector<2x256xf32>, i32 -> vector<2x256xf32>
    %c18 = arith.constant 18 : index
    %c0_59 = arith.constant 0 : index
    %c0_60 = arith.constant 0 : index
    %129 = vector.load %arg4[%c18, %c0_59, %c0_60] : memref<49x8x256xf32, #tpu.memory_space<vmem>>, vector<1x2x256xf32>
    %130 = vector.shape_cast %129 : vector<1x2x256xf32> to vector<2x256xf32>
    %131 = arith.mulf %128, %130 : vector<2x256xf32>
    %132 = arith.addf %112, %131 : vector<2x256xf32>
    %c14_i32 = arith.constant 14 : i32
    %133 = tpu.dynamic_rotate %33 by %c14_i32 dim 1 : vector<2x256xf32>, i32 -> vector<2x256xf32>
    %c19 = arith.constant 19 : index
    %c0_61 = arith.constant 0 : index
    %c0_62 = arith.constant 0 : index
    %134 = vector.load %arg4[%c19, %c0_61, %c0_62] : memref<49x8x256xf32, #tpu.memory_space<vmem>>, vector<1x2x256xf32>
    %135 = vector.shape_cast %134 : vector<1x2x256xf32> to vector<2x256xf32>
    %136 = arith.mulf %133, %135 : vector<2x256xf32>
    %137 = arith.addf %117, %136 : vector<2x256xf32>
    %c13_i32 = arith.constant 13 : i32
    %138 = tpu.dynamic_rotate %33 by %c13_i32 dim 1 : vector<2x256xf32>, i32 -> vector<2x256xf32>
    %c20 = arith.constant 20 : index
    %c0_63 = arith.constant 0 : index
    %c0_64 = arith.constant 0 : index
    %139 = vector.load %arg4[%c20, %c0_63, %c0_64] : memref<49x8x256xf32, #tpu.memory_space<vmem>>, vector<1x2x256xf32>
    %140 = vector.shape_cast %139 : vector<1x2x256xf32> to vector<2x256xf32>
    %141 = arith.mulf %138, %140 : vector<2x256xf32>
    %142 = arith.addf %122, %141 : vector<2x256xf32>
    %c3_i32 = arith.constant 3 : i32
    %143 = tpu.dynamic_rotate %33 by %c3_i32 dim 1 : vector<2x256xf32>, i32 -> vector<2x256xf32>
    %c21 = arith.constant 21 : index
    %c0_65 = arith.constant 0 : index
    %c0_66 = arith.constant 0 : index
    %144 = vector.load %arg4[%c21, %c0_65, %c0_66] : memref<49x8x256xf32, #tpu.memory_space<vmem>>, vector<1x2x256xf32>
    %145 = vector.shape_cast %144 : vector<1x2x256xf32> to vector<2x256xf32>
    %146 = arith.mulf %143, %145 : vector<2x256xf32>
    %147 = arith.addf %127, %146 : vector<2x256xf32>
    %c2_i32 = arith.constant 2 : i32
    %148 = tpu.dynamic_rotate %33 by %c2_i32 dim 1 : vector<2x256xf32>, i32 -> vector<2x256xf32>
    %c22 = arith.constant 22 : index
    %c0_67 = arith.constant 0 : index
    %c0_68 = arith.constant 0 : index
    %149 = vector.load %arg4[%c22, %c0_67, %c0_68] : memref<49x8x256xf32, #tpu.memory_space<vmem>>, vector<1x2x256xf32>
    %150 = vector.shape_cast %149 : vector<1x2x256xf32> to vector<2x256xf32>
    %151 = arith.mulf %148, %150 : vector<2x256xf32>
    %152 = arith.addf %132, %151 : vector<2x256xf32>
    %c1_i32 = arith.constant 1 : i32
    %153 = tpu.dynamic_rotate %33 by %c1_i32 dim 1 : vector<2x256xf32>, i32 -> vector<2x256xf32>
    %c23 = arith.constant 23 : index
    %c0_69 = arith.constant 0 : index
    %c0_70 = arith.constant 0 : index
    %154 = vector.load %arg4[%c23, %c0_69, %c0_70] : memref<49x8x256xf32, #tpu.memory_space<vmem>>, vector<1x2x256xf32>
    %155 = vector.shape_cast %154 : vector<1x2x256xf32> to vector<2x256xf32>
    %156 = arith.mulf %153, %155 : vector<2x256xf32>
    %157 = arith.addf %137, %156 : vector<2x256xf32>
    %c24 = arith.constant 24 : index
    %c0_71 = arith.constant 0 : index
    %c0_72 = arith.constant 0 : index
    %158 = vector.load %arg4[%c24, %c0_71, %c0_72] : memref<49x8x256xf32, #tpu.memory_space<vmem>>, vector<1x2x256xf32>
    %159 = vector.shape_cast %158 : vector<1x2x256xf32> to vector<2x256xf32>
    %160 = arith.mulf %33, %159 : vector<2x256xf32>
    %161 = arith.addf %142, %160 : vector<2x256xf32>
    %c255_i32 = arith.constant 255 : i32
    %162 = tpu.dynamic_rotate %33 by %c255_i32 dim 1 : vector<2x256xf32>, i32 -> vector<2x256xf32>
    %c25 = arith.constant 25 : index
    %c0_73 = arith.constant 0 : index
    %c0_74 = arith.constant 0 : index
    %163 = vector.load %arg4[%c25, %c0_73, %c0_74] : memref<49x8x256xf32, #tpu.memory_space<vmem>>, vector<1x2x256xf32>
    %164 = vector.shape_cast %163 : vector<1x2x256xf32> to vector<2x256xf32>
    %165 = arith.mulf %162, %164 : vector<2x256xf32>
    %166 = arith.addf %147, %165 : vector<2x256xf32>
    %c254_i32 = arith.constant 254 : i32
    %167 = tpu.dynamic_rotate %33 by %c254_i32 dim 1 : vector<2x256xf32>, i32 -> vector<2x256xf32>
    %c26 = arith.constant 26 : index
    %c0_75 = arith.constant 0 : index
    %c0_76 = arith.constant 0 : index
    %168 = vector.load %arg4[%c26, %c0_75, %c0_76] : memref<49x8x256xf32, #tpu.memory_space<vmem>>, vector<1x2x256xf32>
    %169 = vector.shape_cast %168 : vector<1x2x256xf32> to vector<2x256xf32>
    %170 = arith.mulf %167, %169 : vector<2x256xf32>
    %171 = arith.addf %152, %170 : vector<2x256xf32>
    %c253_i32 = arith.constant 253 : i32
    %172 = tpu.dynamic_rotate %33 by %c253_i32 dim 1 : vector<2x256xf32>, i32 -> vector<2x256xf32>
    %c27 = arith.constant 27 : index
    %c0_77 = arith.constant 0 : index
    %c0_78 = arith.constant 0 : index
    %173 = vector.load %arg4[%c27, %c0_77, %c0_78] : memref<49x8x256xf32, #tpu.memory_space<vmem>>, vector<1x2x256xf32>
    %174 = vector.shape_cast %173 : vector<1x2x256xf32> to vector<2x256xf32>
    %175 = arith.mulf %172, %174 : vector<2x256xf32>
    %176 = arith.addf %157, %175 : vector<2x256xf32>
    %c243_i32 = arith.constant 243 : i32
    %177 = tpu.dynamic_rotate %33 by %c243_i32 dim 1 : vector<2x256xf32>, i32 -> vector<2x256xf32>
    %c28 = arith.constant 28 : index
    %c0_79 = arith.constant 0 : index
    %c0_80 = arith.constant 0 : index
    %178 = vector.load %arg4[%c28, %c0_79, %c0_80] : memref<49x8x256xf32, #tpu.memory_space<vmem>>, vector<1x2x256xf32>
    %179 = vector.shape_cast %178 : vector<1x2x256xf32> to vector<2x256xf32>
    %180 = arith.mulf %177, %179 : vector<2x256xf32>
    %181 = arith.addf %161, %180 : vector<2x256xf32>
    %c242_i32 = arith.constant 242 : i32
    %182 = tpu.dynamic_rotate %33 by %c242_i32 dim 1 : vector<2x256xf32>, i32 -> vector<2x256xf32>
    %c29 = arith.constant 29 : index
    %c0_81 = arith.constant 0 : index
    %c0_82 = arith.constant 0 : index
    %183 = vector.load %arg4[%c29, %c0_81, %c0_82] : memref<49x8x256xf32, #tpu.memory_space<vmem>>, vector<1x2x256xf32>
    %184 = vector.shape_cast %183 : vector<1x2x256xf32> to vector<2x256xf32>
    %185 = arith.mulf %182, %184 : vector<2x256xf32>
    %186 = arith.addf %166, %185 : vector<2x256xf32>
    %c241_i32 = arith.constant 241 : i32
    %187 = tpu.dynamic_rotate %33 by %c241_i32 dim 1 : vector<2x256xf32>, i32 -> vector<2x256xf32>
    %c30 = arith.constant 30 : index
    %c0_83 = arith.constant 0 : index
    %c0_84 = arith.constant 0 : index
    %188 = vector.load %arg4[%c30, %c0_83, %c0_84] : memref<49x8x256xf32, #tpu.memory_space<vmem>>, vector<1x2x256xf32>
    %189 = vector.shape_cast %188 : vector<1x2x256xf32> to vector<2x256xf32>
    %190 = arith.mulf %187, %189 : vector<2x256xf32>
    %191 = arith.addf %171, %190 : vector<2x256xf32>
    %c240_i32 = arith.constant 240 : i32
    %192 = tpu.dynamic_rotate %33 by %c240_i32 dim 1 : vector<2x256xf32>, i32 -> vector<2x256xf32>
    %c31 = arith.constant 31 : index
    %c0_85 = arith.constant 0 : index
    %c0_86 = arith.constant 0 : index
    %193 = vector.load %arg4[%c31, %c0_85, %c0_86] : memref<49x8x256xf32, #tpu.memory_space<vmem>>, vector<1x2x256xf32>
    %194 = vector.shape_cast %193 : vector<1x2x256xf32> to vector<2x256xf32>
    %195 = arith.mulf %192, %194 : vector<2x256xf32>
    %196 = arith.addf %176, %195 : vector<2x256xf32>
    %c239_i32 = arith.constant 239 : i32
    %197 = tpu.dynamic_rotate %33 by %c239_i32 dim 1 : vector<2x256xf32>, i32 -> vector<2x256xf32>
    %c32 = arith.constant 32 : index
    %c0_87 = arith.constant 0 : index
    %c0_88 = arith.constant 0 : index
    %198 = vector.load %arg4[%c32, %c0_87, %c0_88] : memref<49x8x256xf32, #tpu.memory_space<vmem>>, vector<1x2x256xf32>
    %199 = vector.shape_cast %198 : vector<1x2x256xf32> to vector<2x256xf32>
    %200 = arith.mulf %197, %199 : vector<2x256xf32>
    %201 = arith.addf %181, %200 : vector<2x256xf32>
    %c238_i32 = arith.constant 238 : i32
    %202 = tpu.dynamic_rotate %33 by %c238_i32 dim 1 : vector<2x256xf32>, i32 -> vector<2x256xf32>
    %c33 = arith.constant 33 : index
    %c0_89 = arith.constant 0 : index
    %c0_90 = arith.constant 0 : index
    %203 = vector.load %arg4[%c33, %c0_89, %c0_90] : memref<49x8x256xf32, #tpu.memory_space<vmem>>, vector<1x2x256xf32>
    %204 = vector.shape_cast %203 : vector<1x2x256xf32> to vector<2x256xf32>
    %205 = arith.mulf %202, %204 : vector<2x256xf32>
    %206 = arith.addf %186, %205 : vector<2x256xf32>
    %c237_i32 = arith.constant 237 : i32
    %207 = tpu.dynamic_rotate %33 by %c237_i32 dim 1 : vector<2x256xf32>, i32 -> vector<2x256xf32>
    %c34 = arith.constant 34 : index
    %c0_91 = arith.constant 0 : index
    %c0_92 = arith.constant 0 : index
    %208 = vector.load %arg4[%c34, %c0_91, %c0_92] : memref<49x8x256xf32, #tpu.memory_space<vmem>>, vector<1x2x256xf32>
    %209 = vector.shape_cast %208 : vector<1x2x256xf32> to vector<2x256xf32>
    %210 = arith.mulf %207, %209 : vector<2x256xf32>
    %211 = arith.addf %191, %210 : vector<2x256xf32>
    %c227_i32 = arith.constant 227 : i32
    %212 = tpu.dynamic_rotate %33 by %c227_i32 dim 1 : vector<2x256xf32>, i32 -> vector<2x256xf32>
    %c35 = arith.constant 35 : index
    %c0_93 = arith.constant 0 : index
    %c0_94 = arith.constant 0 : index
    %213 = vector.load %arg4[%c35, %c0_93, %c0_94] : memref<49x8x256xf32, #tpu.memory_space<vmem>>, vector<1x2x256xf32>
    %214 = vector.shape_cast %213 : vector<1x2x256xf32> to vector<2x256xf32>
    %215 = arith.mulf %212, %214 : vector<2x256xf32>
    %216 = arith.addf %196, %215 : vector<2x256xf32>
    %c226_i32 = arith.constant 226 : i32
    %217 = tpu.dynamic_rotate %33 by %c226_i32 dim 1 : vector<2x256xf32>, i32 -> vector<2x256xf32>
    %c36 = arith.constant 36 : index
    %c0_95 = arith.constant 0 : index
    %c0_96 = arith.constant 0 : index
    %218 = vector.load %arg4[%c36, %c0_95, %c0_96] : memref<49x8x256xf32, #tpu.memory_space<vmem>>, vector<1x2x256xf32>
    %219 = vector.shape_cast %218 : vector<1x2x256xf32> to vector<2x256xf32>
    %220 = arith.mulf %217, %219 : vector<2x256xf32>
    %221 = arith.addf %201, %220 : vector<2x256xf32>
    %c225_i32 = arith.constant 225 : i32
    %222 = tpu.dynamic_rotate %33 by %c225_i32 dim 1 : vector<2x256xf32>, i32 -> vector<2x256xf32>
    %c37 = arith.constant 37 : index
    %c0_97 = arith.constant 0 : index
    %c0_98 = arith.constant 0 : index
    %223 = vector.load %arg4[%c37, %c0_97, %c0_98] : memref<49x8x256xf32, #tpu.memory_space<vmem>>, vector<1x2x256xf32>
    %224 = vector.shape_cast %223 : vector<1x2x256xf32> to vector<2x256xf32>
    %225 = arith.mulf %222, %224 : vector<2x256xf32>
    %226 = arith.addf %206, %225 : vector<2x256xf32>
    %c224_i32 = arith.constant 224 : i32
    %227 = tpu.dynamic_rotate %33 by %c224_i32 dim 1 : vector<2x256xf32>, i32 -> vector<2x256xf32>
    %c38 = arith.constant 38 : index
    %c0_99 = arith.constant 0 : index
    %c0_100 = arith.constant 0 : index
    %228 = vector.load %arg4[%c38, %c0_99, %c0_100] : memref<49x8x256xf32, #tpu.memory_space<vmem>>, vector<1x2x256xf32>
    %229 = vector.shape_cast %228 : vector<1x2x256xf32> to vector<2x256xf32>
    %230 = arith.mulf %227, %229 : vector<2x256xf32>
    %231 = arith.addf %211, %230 : vector<2x256xf32>
    %c223_i32 = arith.constant 223 : i32
    %232 = tpu.dynamic_rotate %33 by %c223_i32 dim 1 : vector<2x256xf32>, i32 -> vector<2x256xf32>
    %c39 = arith.constant 39 : index
    %c0_101 = arith.constant 0 : index
    %c0_102 = arith.constant 0 : index
    %233 = vector.load %arg4[%c39, %c0_101, %c0_102] : memref<49x8x256xf32, #tpu.memory_space<vmem>>, vector<1x2x256xf32>
    %234 = vector.shape_cast %233 : vector<1x2x256xf32> to vector<2x256xf32>
    %235 = arith.mulf %232, %234 : vector<2x256xf32>
    %236 = arith.addf %216, %235 : vector<2x256xf32>
    %c222_i32 = arith.constant 222 : i32
    %237 = tpu.dynamic_rotate %33 by %c222_i32 dim 1 : vector<2x256xf32>, i32 -> vector<2x256xf32>
    %c40 = arith.constant 40 : index
    %c0_103 = arith.constant 0 : index
    %c0_104 = arith.constant 0 : index
    %238 = vector.load %arg4[%c40, %c0_103, %c0_104] : memref<49x8x256xf32, #tpu.memory_space<vmem>>, vector<1x2x256xf32>
    %239 = vector.shape_cast %238 : vector<1x2x256xf32> to vector<2x256xf32>
    %240 = arith.mulf %237, %239 : vector<2x256xf32>
    %241 = arith.addf %221, %240 : vector<2x256xf32>
    %c221_i32 = arith.constant 221 : i32
    %242 = tpu.dynamic_rotate %33 by %c221_i32 dim 1 : vector<2x256xf32>, i32 -> vector<2x256xf32>
    %c41 = arith.constant 41 : index
    %c0_105 = arith.constant 0 : index
    %c0_106 = arith.constant 0 : index
    %243 = vector.load %arg4[%c41, %c0_105, %c0_106] : memref<49x8x256xf32, #tpu.memory_space<vmem>>, vector<1x2x256xf32>
    %244 = vector.shape_cast %243 : vector<1x2x256xf32> to vector<2x256xf32>
    %245 = arith.mulf %242, %244 : vector<2x256xf32>
    %246 = arith.addf %226, %245 : vector<2x256xf32>
    %c211_i32 = arith.constant 211 : i32
    %247 = tpu.dynamic_rotate %33 by %c211_i32 dim 1 : vector<2x256xf32>, i32 -> vector<2x256xf32>
    %c42 = arith.constant 42 : index
    %c0_107 = arith.constant 0 : index
    %c0_108 = arith.constant 0 : index
    %248 = vector.load %arg4[%c42, %c0_107, %c0_108] : memref<49x8x256xf32, #tpu.memory_space<vmem>>, vector<1x2x256xf32>
    %249 = vector.shape_cast %248 : vector<1x2x256xf32> to vector<2x256xf32>
    %250 = arith.mulf %247, %249 : vector<2x256xf32>
    %251 = arith.addf %231, %250 : vector<2x256xf32>
    %c210_i32 = arith.constant 210 : i32
    %252 = tpu.dynamic_rotate %33 by %c210_i32 dim 1 : vector<2x256xf32>, i32 -> vector<2x256xf32>
    %c43 = arith.constant 43 : index
    %c0_109 = arith.constant 0 : index
    %c0_110 = arith.constant 0 : index
    %253 = vector.load %arg4[%c43, %c0_109, %c0_110] : memref<49x8x256xf32, #tpu.memory_space<vmem>>, vector<1x2x256xf32>
    %254 = vector.shape_cast %253 : vector<1x2x256xf32> to vector<2x256xf32>
    %255 = arith.mulf %252, %254 : vector<2x256xf32>
    %256 = arith.addf %236, %255 : vector<2x256xf32>
    %c209_i32 = arith.constant 209 : i32
    %257 = tpu.dynamic_rotate %33 by %c209_i32 dim 1 : vector<2x256xf32>, i32 -> vector<2x256xf32>
    %c44 = arith.constant 44 : index
    %c0_111 = arith.constant 0 : index
    %c0_112 = arith.constant 0 : index
    %258 = vector.load %arg4[%c44, %c0_111, %c0_112] : memref<49x8x256xf32, #tpu.memory_space<vmem>>, vector<1x2x256xf32>
    %259 = vector.shape_cast %258 : vector<1x2x256xf32> to vector<2x256xf32>
    %260 = arith.mulf %257, %259 : vector<2x256xf32>
    %261 = arith.addf %241, %260 : vector<2x256xf32>
    %c208_i32 = arith.constant 208 : i32
    %262 = tpu.dynamic_rotate %33 by %c208_i32 dim 1 : vector<2x256xf32>, i32 -> vector<2x256xf32>
    %c45 = arith.constant 45 : index
    %c0_113 = arith.constant 0 : index
    %c0_114 = arith.constant 0 : index
    %263 = vector.load %arg4[%c45, %c0_113, %c0_114] : memref<49x8x256xf32, #tpu.memory_space<vmem>>, vector<1x2x256xf32>
    %264 = vector.shape_cast %263 : vector<1x2x256xf32> to vector<2x256xf32>
    %265 = arith.mulf %262, %264 : vector<2x256xf32>
    %266 = arith.addf %246, %265 : vector<2x256xf32>
    %c207_i32 = arith.constant 207 : i32
    %267 = tpu.dynamic_rotate %33 by %c207_i32 dim 1 : vector<2x256xf32>, i32 -> vector<2x256xf32>
    %c46 = arith.constant 46 : index
    %c0_115 = arith.constant 0 : index
    %c0_116 = arith.constant 0 : index
    %268 = vector.load %arg4[%c46, %c0_115, %c0_116] : memref<49x8x256xf32, #tpu.memory_space<vmem>>, vector<1x2x256xf32>
    %269 = vector.shape_cast %268 : vector<1x2x256xf32> to vector<2x256xf32>
    %270 = arith.mulf %267, %269 : vector<2x256xf32>
    %271 = arith.addf %251, %270 : vector<2x256xf32>
    %c206_i32 = arith.constant 206 : i32
    %272 = tpu.dynamic_rotate %33 by %c206_i32 dim 1 : vector<2x256xf32>, i32 -> vector<2x256xf32>
    %c47 = arith.constant 47 : index
    %c0_117 = arith.constant 0 : index
    %c0_118 = arith.constant 0 : index
    %273 = vector.load %arg4[%c47, %c0_117, %c0_118] : memref<49x8x256xf32, #tpu.memory_space<vmem>>, vector<1x2x256xf32>
    %274 = vector.shape_cast %273 : vector<1x2x256xf32> to vector<2x256xf32>
    %275 = arith.mulf %272, %274 : vector<2x256xf32>
    %276 = arith.addf %256, %275 : vector<2x256xf32>
    %c205_i32 = arith.constant 205 : i32
    %277 = tpu.dynamic_rotate %33 by %c205_i32 dim 1 : vector<2x256xf32>, i32 -> vector<2x256xf32>
    %c48 = arith.constant 48 : index
    %c0_119 = arith.constant 0 : index
    %c0_120 = arith.constant 0 : index
    %278 = vector.load %arg4[%c48, %c0_119, %c0_120] : memref<49x8x256xf32, #tpu.memory_space<vmem>>, vector<1x2x256xf32>
    %279 = vector.shape_cast %278 : vector<1x2x256xf32> to vector<2x256xf32>
    %280 = arith.mulf %277, %279 : vector<2x256xf32>
    %281 = arith.addf %261, %280 : vector<2x256xf32>
    %282 = arith.addf %281, %266 : vector<2x256xf32>
    %283 = arith.addf %271, %276 : vector<2x256xf32>
    %284 = arith.addf %282, %283 : vector<2x256xf32>
    %285 = vector.extract_strided_slice %284 {offsets = [0, 0], sizes = [1, 256], strides = [1, 1]} : vector<2x256xf32> to vector<1x256xf32>
    %286 = vector.extract_strided_slice %284 {offsets = [1, 0], sizes = [1, 256], strides = [1, 1]} : vector<2x256xf32> to vector<1x256xf32>
    %287 = arith.addf %285, %286 : vector<1x256xf32>
    %288 = arith.negf %287 : vector<1x256xf32>
    %289 = math.exp %288 : vector<1x256xf32>
    %cst_121 = arith.constant 1.000000e+00 : f32
    %290 = vector.broadcast %cst_121 : f32 to vector<1x256xf32>
    %291 = arith.addf %290, %289 : vector<1x256xf32>
    %292 = arith.divf %290, %291 : vector<1x256xf32>
    %c0_122 = arith.constant 0 : index
    %c0_123 = arith.constant 0 : index
    %c0_124 = arith.constant 0 : index
    %293 = vector.load %arg1[%c0_122, %c0_123, %c0_124] : memref<1x32x256xf32, #tpu.memory_space<vmem>>, vector<1x32x256xf32>
    %294 = vector.shape_cast %293 : vector<1x32x256xf32> to vector<32x256xf32>
    %295 = vector.broadcast %22 : vector<32x1xf32> to vector<32x256xf32>
    %296 = arith.mulf %294, %295 : vector<32x256xf32>
    %297 = vector.broadcast %292 : vector<1x256xf32> to vector<32x256xf32>
    %298 = arith.mulf %296, %297 : vector<32x256xf32>
    %c0_125 = arith.constant 0 : index
    %c0_126 = arith.constant 0 : index
    %c0_127 = arith.constant 0 : index
    %299 = vector.load %arg5[%c0_125, %c0_126, %c0_127] : memref<1x32x256xf32, #tpu.memory_space<vmem>>, vector<1x32x256xf32>
    %300 = vector.shape_cast %299 : vector<1x32x256xf32> to vector<32x256xf32>
    %301 = vector.shape_cast %298 : vector<32x256xf32> to vector<1x32x256xf32>
    tpu.vector_store %arg5[%c0_125, %c0_126, %c0_127], %301 {strides = array<i32>} : memref<1x32x256xf32, #tpu.memory_space<vmem>>, vector<1x32x256xf32>,
    return
  }
  func.func @transform_0(%arg0: i32) -> (i32, i32, i32) {
    %c0_i32 = arith.constant 0 : i32
    %c0_i32_0 = arith.constant 0 : i32
    %c0_i32_1 = arith.constant 0 : i32
    return %arg0, %c0_i32, %c0_i32_0 : i32, i32, i32
  }
  func.func @transform_1(%arg0: i32) -> (i32, i32) {
    %c0_i32 = arith.constant 0 : i32
    %c0_i32_0 = arith.constant 0 : i32
    %c0_i32_1 = arith.constant 0 : i32
    return %c0_i32, %c0_i32_0 : i32, i32
  }
  func.func @transform_2(%arg0: i32) -> (i32, i32) {
    %c0_i32 = arith.constant 0 : i32
    %c0_i32_0 = arith.constant 0 : i32
    %c0_i32_1 = arith.constant 0 : i32
    return %c0_i32, %c0_i32_0 : i32, i32
  }
  func.func @transform_3(%arg0: i32) -> (i32, i32, i32) {
    %c0_i32 = arith.constant 0 : i32
    %c0_i32_0 = arith.constant 0 : i32
    %c0_i32_1 = arith.constant 0 : i32
    %c0_i32_2 = arith.constant 0 : i32
    return %c0_i32, %c0_i32_0, %c0_i32_1 : i32, i32, i32
  }
  func.func @transform_4(%arg0: i32) -> (i32, i32, i32) {
    %c0_i32 = arith.constant 0 : i32
    %c0_i32_0 = arith.constant 0 : i32
    %c0_i32_1 = arith.constant 0 : i32
    return %arg0, %c0_i32, %c0_i32_0 : i32, i32, i32
  }
}

</mosaic_0001>

<bundles_post_ra>
// kernel: tpu_custom_call.1
= control target key start
LH: loop header
LB: loop body
LE: loop exit
PB: predicated region body
PF: predicated region fallthrough
CT: control target
= control target key end

     0   :  { %9 = vsyncpa [#allocation3], 0  ;;  %s2393_s0 = inlined_call_operand.hbm [shape: f32[2,32,256], index: 0, kind: input, shape index: {}]   ;;  %s2394_s1 = inlined_call_operand.vmem [shape: f32[2,32], index: 1, kind: input, shape index: {}]   ;;  %s2395_s2 = inlined_call_operand.vmem [shape: f32[32,2], index: 2, kind: input, shape index: {}]   ;;  %s2396_s3 = inlined_call_operand.hbm [shape: f32[49,8,256], index: 3, kind: input, shape index: {}]   ;;  %s2397_s4 = inlined_call_operand.hbm [shape: f32[2,32,256], index: 4, kind: output, shape index: {}]  }
   0x1   :  { %11 = vsyncpa [#allocation3 + $0x1], 0 }
   0x2   :  { %12 = vsyncpa [#allocation6], 0 }
   0x3   :  { %13 = vsyncpa [#allocation4], 0 }
   0x4   :  { %15 = vsyncpa [#allocation4 + $0x1], 0  ;;  %s1766_s15 = smov 0   ;;  %s1768_s16 = smov 0  }
   0x5   :  { %s1770_s17 = smov 0   ;;  %s1772_s18 = smov 0  }
   0x6 LB: > { %s1787_s19 = sadd.s32 4294967295, %s1684_s18   ;;  %s1380_s20 = sadd.s32 4294967294, %s1684_s18   ;;  %s1684_s18 = sphi %s1772_s18, %s2407_s18   ;;  %s1680_s17 = sphi %s1770_s17, %s2406_s17   ;;  %s1676_s16 = sphi %s1768_s16, %s2405_s16   ;;  %s1672_s15 = sphi %s1766_s15, %s2404_s15  }
   0x7   : > { %p41_p0 = scmp.ne.s32.totalorder %s1676_s16, %s1672_s15  ;;  %p42_p1 = scmp.eq.s32.totalorder %s1787_s19, 0 }
   0x8   : > { %p128_p2 = scmp.eq.s32.totalorder %s1787_s19, 1  ;;  %p134_p3 = scmp.eq.s32.totalorder %s1380_s20, 1 }
   0x9   : > { %p1796_p4 = por %p42_p1, %p41_p0  ;;  %p1381_p5 = scmp.ge.s32.totalorder %s1684_s18, 1 }
   0xa   : > { %p1801_p6 = por %p134_p3, %p41_p0  ;;  %p141_p7 = scmp.lt.s32.totalorder %s1684_s18, 3 }
   0xb   : > { %s158_s25 = sshll.u32 %s2396_s3, 4  ;;  %s1686_s27 = smov [#allocation5]   ;;  %s159_s25 = int_to_ptr.hbm [resolvable:$true] %s158_s25 }
   0xc   : > { %p1809_p8 = pnand %p1381_p5, %p141_p7  ;;  %s160_s28 = sshll.u32 %s1686_s27, 4  ;;  %s161_s28 = int_to_ptr.vmem [resolvable:$true] %s160_s28 }
   0xd   : > { %s1819_s29 = sadd.s32 1, %s1684_s18   ;;  %s1687_s30 = smov 256  }
   0xe   : > { %p1420_p9 = pneg %p1809_p8  ;;  %s1688_s5 = smov 16  }
   0xf   : > { %s25_s6 = ssub.s32 %s1684_s18, %s1819_s29  ;;  %s28_s7 = sadd.s32 1, %s1680_s17 }
  0x10   : > { %p1421_p10 = pnand %p1420_p9, %p42_p1  ;;  %p26_p12 = scmp.eq.s32.totalorder %s25_s6, 0 }
  0x11   : > { %p35_p13 = scmp.ne.s32.totalorder %s1680_s17, %s1676_s16  ;;  %p36_p0 = scmp.eq.s32.totalorder %s1684_s18, 0 }
  0x12   : > { %1423 = dma.hbm_to_vmem [thread:$0]  (!%p1421_p10), %s159_s25, 12544, %s161_s28, [#allocation6], %s1687_s30, %s1687_s30, %s1688_s5  }
  0x13   : > { %s1831_s8 = scalar_select %p26_p12, %s1680_s17, %s28_s7  }
  0x14   : > { %p1835_p3 = por %p128_p2, %p35_p13  ;;  %p1433_p5 = scmp.lt.s32.totalorder %s1684_s18, 2 }
  0x15   : > { %s174_s10 = sand.u32 1, %s1680_s17   ;;  %s1408_s11 = sshll.u32 %s1684_s18, 6 }
  0x16   : > { %p37_p7 = por %p36_p0, %p35_p13  ;;  %s1384_s12 = sshll.u32 %s174_s10, 6 }
  0x17   : > { %s183_s20 = scalar_lea.hbm %s2393_s0, %s1408_s11  ;;  %s178_s24 = scalar_lea.vmem [#allocation2], %s1384_s12 }
  0x18   : > { %s184_s23 = sshll.u32 %s183_s20, 4  ;;  %s186_s25 = sshll.u32 %s178_s24, 4  ;;  %s185_s23 = int_to_ptr.hbm [resolvable:$true] %s184_s23  ;;  %s187_s25 = int_to_ptr.vmem [resolvable:$true] %s186_s25 }
  0x19   : > { %p1845_p9 = pnand %p1433_p5, %p37_p7  ;;  %s175_s28 = scalar_lea.sflag [#allocation3], %s174_s10 }
  0x1a   : > { %s1584_s6 = sshra.s32 %s185_s23, 4  ;;  %s1591_s12 = scalar_lea.hbm %s2393_s0, 128  ;;  %s1585_s6 = int_to_ptr.hbm [resolvable:$true] %s1584_s6 }
  0x1b   : > { %s1586_s7 = scalar_lea.hbm %s1585_s6, 64  ;;  %p1588_p10 = pneg %p1845_p9 }
  0x1c   : > { %p1587_p2 = scmp.ne.s32.totalorder %s1585_s6, %s1586_s7  ;;  %p1592_p0 = scmp.lt.s32.totalorder %s1585_s6, %s2393_s0 }
  0x1d   : > { %p1593_p5 = scmp.lt.s32.totalorder %s1591_s12, %s1586_s7 }
  0x1e   : > { %p1589_p12 = pnand %p1588_p10, %p1587_p2 }
  0x1f   : > { %p1594_p7 = por %p1593_p5, %p1592_p0 }
  0x20   : > { %p1590_p13 = pneg %p1589_p12 }
  0x22   : > { %p1595_p11 = pnand %p1594_p7, %p1590_p13 }
  0x24   : > { %1598 = shalt.err (!%p1595_p11)
}
  0x25   : > { %1427 = dma.hbm_to_vmem [thread:$0]  (!%p1845_p9), %s185_s23, 1024, %s187_s25, %s175_s28, %s1687_s30, %s1687_s30, %s1688_s5  }
  0x26   : > { %198 = sbr.rel (%p1809_p8) target bundleno = 1156 (0x484), region = 36  ;;  %s1865_s10 = sand.u32 (!%p1809_p8), 1, %s1676_s16  }
  0x27   : > { %s1388_s24 = sshll.u32 (!%p1809_p8), %s1865_s10, 6  ;;  %s201_s6 = scalar_lea.sflag (!%p1809_p8), [#allocation3], %s1865_s10 }
  0x28   : > { %s204_s7 = scalar_lea.vmem (!%p1809_p8), [#allocation2], %s1388_s24 }
  0x2b   : > { %1659 = dma.done.wait (%p1796_p4), %s201_s6, 1024  }
  0x2c   : > { %1661 = vsyncadd (%p1796_p4), %s201_s6, 4294966272 }
  0x2d   : > { %1663 = dma.done.wait (%p42_p1), [#allocation6], 12544  }
  0x2e   : > { %1665 = vsyncadd (%p42_p1), [#allocation6], 4294954752  ;;  %v1879_v0 = vld [vmem:[%s204_s7 + $0x30] sm:$0xff]  ;;  %v1881_v1 = vld [vmem:[%s204_s7 + $0x38] sm:$0xff]  ;;  %v1689_v16 = vmov 256.0   ;;  %vm283_vm1 = vcmask 7168  }
  0x2f   : > { %v1883_v2 = vld [vmem:[%s204_s7 + $0x20] sm:$0xff]  ;;  %v257_v3 = vadd.f32 %v1881_v1, %v1879_v0  ;;  %v280_v4 = vmax.f32 %v1879_v0, %v1881_v1  ;;  %v1889_v5 = vld [vmem:[%s204_s7 + $0x28] sm:$0xff]  ;;  %v1893_v7 = vld [vmem:[%s204_s7 + $0x10] sm:$0xff]  ;;  %1526 = vrcp.f32 %v1689_v16  ;;  %vm288_vm2 = vcmask 261120   ;;  %s1690_s12 = smov 127   ;;  %s1693_s14 = smov 51  }
  0x30   : > { %v277_v6 = vmax.f32 %v1883_v2, %v1889_v5  ;;  %v1895_v8 = vld [vmem:[%s204_s7 + $0x18] sm:$0xff]  ;;  %v1897_v9 = vld [vmem:[%s204_s7] sm:$0xff]  ;;  %v1899_v10 = vld [vmem:[%s204_s7 + $0x8] sm:$0xff]  ;;  %v254_v11 = vadd.f32 %v1889_v5, %v1883_v2  ;;  %vm326_vm3 = vcmask 1041408   ;;  %vm313_vm4 = vcmask 15360   ;;  %s1694_s20 = smov 50  }
  0x31   : > { %258 = vadd.xlane.f32.xlu0 %v257_v3  ;;  %281 = vmax.xlane.f32.xlu1 %v280_v4  ;;  %v251_v12 = vadd.f32 %v1895_v8, %v1893_v7  ;;  %v248_v13 = vadd.f32 %v1899_v10, %v1897_v9  ;;  %v274_v14 = vmax.f32 %v1893_v7, %v1895_v8  ;;  %v235_v39 = vld [vmem:[%s2394_s1] sm:$0x3]  ;;  %v237_v43 = vld [vmem:[%s2395_s2 + $0x8] sm:$0xff]  ;;  %v239_v44 = vld [vmem:[%s2395_s2 + $0x18] sm:$0xff]  ;;  %v1691_v50 = vmov 0   ;;  %s1695_s6 = smov 49  }
  0x32   : > { %278 = vmax.xlane.f32.xlu2 %v277_v6  ;;  %v271_v15 = vmax.f32 %v1897_v9, %v1899_v10  ;;  %v236_v42 = vld [vmem:[%s2395_s2] sm:$0xff]  ;;  %v238_v45 = vld [vmem:[%s2395_s2 + $0x10] sm:$0xff]  ;;  %1523 = vset.pattern.permute.xlu0 %v1691_v50  ;;  %s1696_s7 = smov 48   ;;  %s1697_s21 = smov 47  }
  0x33   : > { %1524 = vset.pattern.permute.xlu2 %v1691_v50  ;;  %1525 = vset.pattern.permute.xlu1 %v1691_v50  ;;  %s1698_s26 = smov 46   ;;  %s1699_s30 = smov 45  }
  0x34   : > { %s1700_s5 = smov 35   ;;  %s1701_s23 = smov 34  }
  0x35   : > { %v1527_v17 = vpop.eup %1526  ;;  %s1702_s25 = smov 33   ;;  %s1703_s27 = smov 32  }
  0x36   : > { %v261_v18 = vmul.f32 256.0, %v1527_v17  ;;  %vm265_vm0 = vweird.f32 %v1527_v17  ;;  %s1704_s28 = smov 31   ;;  %s1705_s11 = smov 30  }
  0x37   : > { %s1706_s13 = smov 29  }
  0x38   : > { %v262_v19 = vsub.f32 1.0, %v261_v18 }
  0x39   : > { %255 = vadd.xlane.f32.xlu0 %v254_v11  ;;  %252 = vadd.xlane.f32.xlu1 %v251_v12 }
  0x3a   : > { %249 = vadd.xlane.f32.xlu2 %v248_v13  ;;  %v263_v20 = vmul.f32 %v1527_v17, %v262_v19 }
  0x3c   : > { %v264_v21 = vadd.f32 %v1527_v17, %v263_v20 }
  0x3e   : > { %v266_v22 = vsel %vm265_vm0, %v1527_v17, %v264_v21 }
  0x41   : > { %275 = vmax.xlane.f32.xlu0 %v274_v14  ;;  %272 = vmax.xlane.f32.xlu1 %v271_v15 }
  0xa4   : > { %v259_v23 = vpop.xlane.xlu0 %258  ;;  %v282_v24 = vpop.xlane.xlu1 %281 }
  0xa5   : > { %v270_v25 = vmul.f32 %v266_v22, %v259_v23  ;;  %v279_v26 = vpop.xlane.xlu2 %278 }
  0xa7   : > { %v287_v27 = vsel %vm283_vm1, %v270_v25, %v282_v24 }
  0xa8   : > { %304 = vmatpush.msra.mxu0 %v287_v27 }
  0xac   : > { %v256_v28 = vpop.xlane.xlu0 %255  ;;  %v253_v29 = vpop.xlane.xlu1 %252 }
  0xad   : > { %v269_v30 = vmul.f32 %v266_v22, %v256_v28  ;;  %v250_v31 = vpop.xlane.xlu2 %249  ;;  %v268_v34 = vmul.f32 %v266_v22, %v253_v29 }
  0xae   : > { %v267_v33 = vmul.f32 %v266_v22, %v250_v31 }
  0xaf   : > { %v286_v32 = vsel %vm283_vm1, %v269_v30, %v279_v26 }
  0xb0   : > { %305 = vmatpush.msra.mxu0 %v286_v32 }
  0xb4   : > { %v276_v35 = vpop.xlane.xlu0 %275  ;;  %v273_v36 = vpop.xlane.xlu1 %272 }
  0xb5   : > { %v285_v37 = vsel %vm283_vm1, %v268_v34, %v276_v35  ;;  %v284_v38 = vsel %vm283_vm1, %v267_v33, %v273_v36 }
  0xb6   : > { %306 = vmatpush.msra.mxu0 %v285_v37 }
  0xb8   : > { %307 = vmatpush.msra.mxu0 %v284_v38 }
  0xb9   : > { %1391 = vmatmul.msk.f32.vlgmr.msra.gmra.mxu0 %vm288_vm2, %v235_v39 }
 0x136   : > { %v309_v40 = vpop.f32.mrf.mxu0 }
 0x137   : > { %v312_v41 = vmax.f32 %v309_v40, 0.0 }
 0x139   : > { %1392 = vmatpush.msk.msra.mxu1 %vm326_vm3, %v312_v41  ;;  %1410 = vmatpush.msk.msra.mxu2 %vm326_vm3, %v312_v41 }
 0x13a   : > { %1411 = vmatpush.msk.msra.mxu3 %vm326_vm3, %v312_v41  ;;  %1393 = vmatmul.msk.f32.vlgmr.msra.gmra.mxu1 %vm313_vm4, %v236_v42 }
 0x13b   : > { %1394 = vmatmul.msk.f32.vlgmr.msra.gmra.mxu2 %vm313_vm4, %v237_v43  ;;  %1396 = vmatmul.msk.f32.vlgmr.msra.gmra.mxu3 %vm313_vm4, %v239_v44 }
 0x143   : > { %1395 = vmatmul.msk.f32.gmra.mxu2 %vm313_vm4, %v238_v45 }
 0x1b7   : > { %v347_v46 = vpop.f32.mrf.mxu1 }
 0x1b8   : > { %363 = vrot.lane.b32.xlu2 %v347_v46, %s1690_s12 }
 0x1be   : > { %v350_v47 = vpop.f32.mrf.mxu2  ;;  %v356_v48 = vpop.f32.mrf.mxu3 }
 0x1bf   : > { %365 = vrot.lane.b32.xlu0 %v350_v47, %s1690_s12 }
 0x1c0   : > { %369 = vrot.lane.b32.xlu2 %v356_v48, %s1690_s12 }
 0x1c6   : > { %v353_v49 = vpop.f32.mrf.mxu2 }
 0x1c7   : > { %367 = vrot.lane.b32.xlu1 %v353_v49, %s1690_s12 }
 0x212   : > { %v364_v51 = vpop.permute.xlu2 %363 }
 0x213   : > { %v375_v52 = vadd.f32 %v364_v51, %v347_v46 }
 0x215   : > { %v1397_v53 = vmul.f32 -1.442695, %v375_v52 }
 0x217   : > { %1528 = vpow2.f32 %v1397_v53 }
 0x21a   : > { %v370_v56 = vpop.permute.xlu2 %369 }
 0x21b   : > { %v378_v58 = vadd.f32 %v370_v56, %v356_v48  ;;  %v1692_v56 = vmov 32.0  }
 0x21d   : > { %v1529_v54 = vpop.eup %1528  ;;  %v1400_v61 = vmul.f32 -1.442695, %v378_v58 }
 0x21e   : > { %v391_v55 = vadd.f32 1.0, %v1529_v54 }
 0x220   : > { %1530 = vrcp.f32 %v391_v55  ;;  %v406_v62 = vand.u32 2147483648, %v391_v55  ;;  %v404_v3 = vand.u32 2147483647, %v391_v55  ;;  %vm400_vm6 = vweird.f32 %v391_v55 }
 0x221   : > { %1532 = vpow2.f32 %v1400_v61 }
 0x222   : > { %v407_v6 = vor.u32 1.1754944e-38, %v406_v62  ;;  %vm405_vm8 = vcmp.eq.f32.partialorder %v404_v3, 8.507059e+37 }
 0x226   : > { %v1531_v57 = vpop.eup %1530 }
 0x227   : > { %v396_v59 = vmul.f32 %v1531_v57, %v391_v55  ;;  %vm401_vm5 = vweird.f32 %v1531_v57  ;;  %v1533_v15 = vpop.eup %1532 }
 0x228   : > { %vm402_vm7 = vmor %vm400_vm6, %vm401_vm5  ;;  %v394_v17 = vadd.f32 1.0, %v1533_v15  ;;  %vm528_vm6 = vcmask 1040384  }
 0x229   : > { %v397_v60 = vsub.f32 1.0, %v396_v59 }
 0x22a   : > { %vm445_vm14 = vweird.f32 %v394_v17  ;;  %v451_v44 = vand.u32 2147483648, %v394_v17 }
 0x22b   : > { %v398_v63 = vmul.f32 %v1531_v57, %v397_v60 }
 0x22c   : > { %v452_v51 = vor.u32 1.1754944e-38, %v451_v44 }
 0x22d   : > { %v399_v4 = vadd.f32 %v1531_v57, %v398_v63 }
 0x22f   : > { %v403_v11 = vsel %vm402_vm7, %v1531_v57, %v399_v4 }
 0x230   : > { %v408_v12 = vsel %vm405_vm8, %v407_v6, %v403_v11 }
 0x231   : > { %v366_v13 = vpop.permute.xlu0 %365  ;;  %457 = vperm.xlu0 %1523, %v408_v12  }
 0x232   : > { %v376_v14 = vadd.f32 %v366_v13, %v350_v47  ;;  %v449_v47 = vand.u32 2147483647, %v394_v17 }
 0x234   : > { %v1398_v16 = vmul.f32 -1.442695, %v376_v14  ;;  %vm450_vm4 = vcmp.eq.f32.partialorder %v449_v47, 8.507059e+37 }
 0x236   : > { %1534 = vpow2.f32 %v1398_v16 }
 0x237   : > { %1536 = vrcp.f32 %v394_v17 }
 0x239   : > { %v368_v18 = vpop.permute.xlu1 %367 }
 0x23a   : > { %v377_v19 = vadd.f32 %v368_v18, %v353_v49 }
 0x23c   : > { %v1535_v20 = vpop.eup %1534  ;;  %v1399_v21 = vmul.f32 -1.442695, %v377_v19 }
 0x23d   : > { %v392_v22 = vadd.f32 1.0, %v1535_v20  ;;  %v1537_v23 = vpop.eup %1536 }
 0x23e   : > { %1538 = vpow2.f32 %v1399_v21  ;;  %v441_v25 = vmul.f32 %v1537_v23, %v394_v17  ;;  %vm446_vm13 = vweird.f32 %v1537_v23 }
 0x23f   : > { %1540 = vrcp.f32 %v392_v22  ;;  %v421_v31 = vand.u32 2147483648, %v392_v22  ;;  %v419_v33 = vand.u32 2147483647, %v392_v22  ;;  %vm415_vm10 = vweird.f32 %v392_v22  ;;  %vm447_vm0 = vmor %vm445_vm14, %vm446_vm13 }
 0x240   : > { %v442_v30 = vsub.f32 1.0, %v441_v25 }
 0x241   : > { %v422_v37 = vor.u32 1.1754944e-38, %v421_v31  ;;  %vm420_vm12 = vcmp.eq.f32.partialorder %v419_v33, 8.507059e+37 }
 0x242   : > { %v443_v35 = vmul.f32 %v1537_v23, %v442_v30 }
 0x244   : > { %v1539_v24 = vpop.eup %1538  ;;  %v444_v42 = vadd.f32 %v1537_v23, %v443_v35 }
 0x245   : > { %v1541_v26 = vpop.eup %1540  ;;  %v393_v27 = vadd.f32 1.0, %v1539_v24 }
 0x246   : > { %v411_v28 = vmul.f32 %v1541_v26, %v392_v22  ;;  %vm416_vm9 = vweird.f32 %v1541_v26  ;;  %v448_v49 = vsel %vm447_vm0, %v1537_v23, %v444_v42 }
 0x247   : > { %1542 = vrcp.f32 %v393_v27  ;;  %vm417_vm11 = vmor %vm415_vm10, %vm416_vm9  ;;  %v436_v43 = vand.u32 2147483648, %v393_v27  ;;  %v434_v46 = vand.u32 2147483647, %v393_v27  ;;  %vm430_vm1 = vweird.f32 %v393_v27 }
 0x248   : > { %v412_v29 = vsub.f32 1.0, %v411_v28  ;;  %v453_v54 = vsel %vm450_vm4, %v452_v51, %v448_v49  ;;  %1544 = vrcp.f32 %v1692_v56 }
 0x249   : > { %v437_v50 = vor.u32 1.1754944e-38, %v436_v43  ;;  %vm435_vm3 = vcmp.eq.f32.partialorder %v434_v46, 8.507059e+37 }
 0x24a   : > { %v413_v32 = vmul.f32 %v1541_v26, %v412_v29 }
 0x24c   : > { %v414_v34 = vadd.f32 %v1541_v26, %v413_v32 }
 0x24d   : > { %v1543_v36 = vpop.eup %1542 }
 0x24e   : > { %v418_v38 = vsel %vm417_vm11, %v1541_v26, %v414_v34  ;;  %v426_v39 = vmul.f32 %v1543_v36, %v393_v27  ;;  %vm431_vm15 = vweird.f32 %v1543_v36  ;;  %v1545_v59 = vpop.eup %1544 }
 0x24f   : > { %v423_v40 = vsel %vm420_vm12, %v422_v37, %v418_v38  ;;  %vm432_vm2 = vmor %vm430_vm1, %vm431_vm15  ;;  %v502_v6 = vmul.f32 32.0, %v1545_v59  ;;  %vm506_vm5 = vweird.f32 %v1545_v59 }
 0x250   : > { %462 = vperm.xlu2 %1524, %v423_v40   ;;  %v427_v41 = vsub.f32 1.0, %v426_v39 }
 0x251   : > { %v503_v15 = vsub.f32 1.0, %v502_v6 }
 0x252   : > { %v428_v45 = vmul.f32 %v1543_v36, %v427_v41 }
 0x253   : > { %v504_v23 = vmul.f32 %v1545_v59, %v503_v15 }
 0x254   : > { %v429_v48 = vadd.f32 %v1543_v36, %v428_v45 }
 0x255   : > { %v505_v32 = vadd.f32 %v1545_v59, %v504_v23 }
 0x256   : > { %v433_v52 = vsel %vm432_vm2, %v1543_v36, %v429_v48 }
 0x257   : > { %v438_v53 = vsel %vm435_vm3, %v437_v50, %v433_v52  ;;  %v507_v41 = vsel %vm506_vm5, %v1545_v59, %v505_v32  ;;  %v535_v52 = vlaneseq }
 0x258   : > { %467 = vperm.xlu1 %1525, %v438_v53   ;;  %472 = vperm.xlu2 %1524, %v453_v54  }
 0x259   : > { %v2022_v54 = vand.u32 127, %v535_v52 }
 0x25b   : > { %vm537_vm7 = vcmp.lt.s32.totalorder %v2022_v54, 51  ;;  %vm564_vm8 = vcmp.lt.s32.totalorder %v2022_v54, 49  ;;  %vm550_vm9 = vcmp.lt.s32.totalorder %v2022_v54, 50  ;;  %vm578_vm10 = vcmp.lt.s32.totalorder %v2022_v54, 48 }
 0x25c   : > { %vm606_vm11 = vcmp.lt.s32.totalorder %v2022_v54, 46  ;;  %vm592_vm12 = vcmp.lt.s32.totalorder %v2022_v54, 47  ;;  %vm620_vm13 = vcmp.lt.s32.totalorder %v2022_v54, 45  ;;  %vm648_vm14 = vcmp.lt.s32.totalorder %v2022_v54, 34 }
 0x25d   : > { %vm634_vm15 = vcmp.lt.s32.totalorder %v2022_v54, 35  ;;  %vm662_vm0 = vcmp.lt.s32.totalorder %v2022_v54, 33  ;;  %vm690_vm1 = vcmp.lt.s32.totalorder %v2022_v54, 31  ;;  %vm676_vm2 = vcmp.lt.s32.totalorder %v2022_v54, 32 }
 0x25e   : > { %vm704_vm3 = vcmp.lt.s32.totalorder %v2022_v54, 30  ;;  %vm732_vm4 = vcmp.lt.s32.totalorder %v2022_v54, 19  ;;  %vm718_vm5 = vcmp.lt.s32.totalorder %v2022_v54, 29 }
 0x2a3   : > { %v458_v58 = vpop.permute.xlu0 %457 }
 0x2a4   : > { %v1947_v3 = vmul.f32 %v458_v58, %v1897_v9  ;;  %v1950_v4 = vmul.f32 %v458_v58, %v1899_v10 }
 0x2aa   : > { %v463_v55 = vpop.permute.xlu2 %462 }
 0x2ab   : > { %v1935_v60 = vmul.f32 %v463_v55, %v1893_v7  ;;  %v1938_v61 = vmul.f32 %v463_v55, %v1895_v8 }
 0x2ad   : > { %v483_v7 = vadd.f32 %v1935_v60, %v1947_v3  ;;  %v492_v8 = vadd.f32 %v1938_v61, %v1950_v4 }
 0x2b2   : > { %v473_v57 = vpop.permute.xlu2 %472 }
 0x2b3   : > { %v1941_v62 = vmul.f32 %v473_v57, %v1879_v0  ;;  %v1944_v63 = vmul.f32 %v473_v57, %v1881_v1 }
 0x2b5   : > { %v511_v9 = vmax.f32 %v1935_v60, %v1941_v62  ;;  %v520_v10 = vmax.f32 %v1938_v61, %v1944_v63 }
 0x2ca   : > { %v468_v11 = vpop.permute.xlu1 %467 }
 0x2cb   : > { %v1957_v0 = vmul.f32 %v468_v11, %v1883_v2  ;;  %v1960_v1 = vmul.f32 %v468_v11, %v1889_v5 }
 0x2cd   : > { %v484_v12 = vadd.f32 %v483_v7, %v1957_v0  ;;  %v493_v13 = vadd.f32 %v492_v8, %v1960_v1  ;;  %v510_v14 = vmax.f32 %v1947_v3, %v1957_v0  ;;  %v519_v2 = vmax.f32 %v1950_v4, %v1960_v1 }
 0x2cf   : > { %v485_v5 = vadd.f32 %v484_v12, %v1941_v62  ;;  %v494_v16 = vadd.f32 %v493_v13, %v1944_v63  ;;  %v512_v17 = vmax.f32 %v510_v14, %v511_v9  ;;  %v521_v18 = vmax.f32 %v519_v2, %v520_v10 }
 0x2d1   : > { %v486_v19 = vrot.slane %v485_v5, 4  ;;  %v495_v20 = vrot.slane %v494_v16, 4  ;;  %v513_v21 = vrot.slane %v512_v17, 4  ;;  %v522_v22 = vrot.slane %v521_v18, 4 }
 0x2d3   : > { %v487_v24 = vadd.f32 %v486_v19, %v485_v5  ;;  %v496_v25 = vadd.f32 %v495_v20, %v494_v16  ;;  %v514_v26 = vmax.f32 %v512_v17, %v513_v21  ;;  %v523_v27 = vmax.f32 %v521_v18, %v522_v22  ;;  %v540_v16 = vld [vmem:[#allocation5] sm:$0x3]  ;;  %v554_v17 = vld [vmem:[#allocation5 + $0x10] sm:$0x3]  ;;  %v555_v18 = vld [vmem:[#allocation5 + $0x18] sm:$0x3] }
 0x2d4   : > { %v610_v19 = vld [vmem:[#allocation5 + $0x50] sm:$0x3]  ;;  %v611_v20 = vld [vmem:[#allocation5 + $0x58] sm:$0x3]  ;;  %v541_v21 = vld [vmem:[#allocation5 + $0x8] sm:$0x3] }
 0x2d5   : > { %v488_v28 = vrot.slane %v487_v24, 2  ;;  %v497_v29 = vrot.slane %v496_v25, 2  ;;  %v515_v30 = vrot.slane %v514_v26, 2  ;;  %v524_v31 = vrot.slane %v523_v27, 2 }
 0x2d7   : > { %v489_v33 = vadd.f32 %v488_v28, %v487_v24  ;;  %v498_v34 = vadd.f32 %v497_v29, %v496_v25  ;;  %v516_v35 = vmax.f32 %v514_v26, %v515_v30  ;;  %v525_v36 = vmax.f32 %v523_v27, %v524_v31  ;;  %v596_v24 = vld [vmem:[#allocation5 + $0x40] sm:$0x3]  ;;  %v597_v25 = vld [vmem:[#allocation5 + $0x48] sm:$0x3] }
 0x2d9   : > { %v490_v37 = vrot.slane %v489_v33, 1  ;;  %v499_v38 = vrot.slane %v498_v34, 1  ;;  %v517_v39 = vrot.slane %v516_v35, 1  ;;  %v526_v40 = vrot.slane %v525_v36, 1 }
 0x2db   : > { %v491_v42 = vadd.f32 %v490_v37, %v489_v33  ;;  %v500_v43 = vadd.f32 %v499_v38, %v498_v34  ;;  %v518_v46 = vmax.f32 %v516_v35, %v517_v39  ;;  %v527_v47 = vmax.f32 %v525_v36, %v526_v40 }
 0x2dd   : > { %v508_v44 = vmul.f32 %v507_v41, %v491_v42  ;;  %v509_v45 = vmul.f32 %v507_v41, %v500_v43  ;;  %v568_v43 = vld [vmem:[#allocation5 + $0x20] sm:$0x3] }
 0x2df   : > { %v1974_v48 = vsel %vm528_vm6, %v508_v44, %v518_v46  ;;  %v1976_v49 = vsel %vm528_vm6, %v509_v45, %v527_v47  ;;  %v569_v44 = vld [vmem:[#allocation5 + $0x28] sm:$0x3]  ;;  %v624_v47 = vld [vmem:[#allocation5 + $0x60] sm:$0x3]  ;;  %vm746_vm6 = vcmp.lt.s32.totalorder %v2022_v54, 18 }
 0x2e0   : > { %533 = vrot.lane.b32.xlu0 %v1976_v49, %s1693_s14  ;;  %546 = vrot.lane.b32.xlu2 %v1974_v48, %s1694_s20 }
 0x2e1   : > { %531 = vrot.lane.b32.xlu1 %v1974_v48, %s1693_s14  ;;  %s1707_s14 = smov 19  }
 0x2e8   : > { %560 = vrot.lane.b32.xlu0 %v1974_v48, %s1695_s6  ;;  %562 = vrot.lane.b32.xlu2 %v1976_v49, %s1695_s6  ;;  %s1709_s6 = smov 17  }
 0x2e9   : > { %548 = vrot.lane.b32.xlu1 %v1976_v49, %s1694_s20  ;;  %s1708_s20 = smov 18  }
 0x2f0   : > { %576 = vrot.lane.b32.xlu0 %v1976_v49, %s1696_s7  ;;  %588 = vrot.lane.b32.xlu2 %v1974_v48, %s1697_s21 }
 0x2f1   : > { %574 = vrot.lane.b32.xlu1 %v1974_v48, %s1696_s7  ;;  %s1710_s7 = smov 16  }
 0x2f8   : > { %602 = vrot.lane.b32.xlu0 %v1974_v48, %s1698_s26  ;;  %604 = vrot.lane.b32.xlu2 %v1976_v49, %s1698_s26  ;;  %s1712_s26 = smov 14  }
 0x2f9   : > { %590 = vrot.lane.b32.xlu1 %v1976_v49, %s1697_s21  ;;  %s1711_s21 = smov 15  }
 0x300   : > { %618 = vrot.lane.b32.xlu0 %v1976_v49, %s1699_s30  ;;  %630 = vrot.lane.b32.xlu2 %v1974_v48, %s1700_s5 }
 0x301   : > { %616 = vrot.lane.b32.xlu1 %v1974_v48, %s1699_s30  ;;  %s1713_s30 = smov 13  }
 0x308   : > { %644 = vrot.lane.b32.xlu0 %v1974_v48, %s1701_s23  ;;  %646 = vrot.lane.b32.xlu2 %v1976_v49, %s1701_s23  ;;  %s1715_s23 = smov 2  }
 0x309   : > { %632 = vrot.lane.b32.xlu1 %v1976_v49, %s1700_s5  ;;  %s1714_s5 = smov 3  }
 0x310   : > { %660 = vrot.lane.b32.xlu0 %v1976_v49, %s1702_s25  ;;  %672 = vrot.lane.b32.xlu2 %v1974_v48, %s1703_s27 }
 0x311   : > { %658 = vrot.lane.b32.xlu1 %v1974_v48, %s1702_s25  ;;  %s1716_s25 = smov 1  }
 0x318   : > { %686 = vrot.lane.b32.xlu0 %v1974_v48, %s1704_s28  ;;  %688 = vrot.lane.b32.xlu2 %v1976_v49, %s1704_s28  ;;  %s1718_s28 = smov 125  }
 0x319   : > { %674 = vrot.lane.b32.xlu1 %v1976_v49, %s1703_s27  ;;  %s1717_s27 = smov 126  }
 0x320   : > { %702 = vrot.lane.b32.xlu0 %v1976_v49, %s1705_s11  ;;  %714 = vrot.lane.b32.xlu2 %v1974_v48, %s1706_s13 }
 0x321   : > { %700 = vrot.lane.b32.xlu1 %v1974_v48, %s1705_s11  ;;  %s1720_s11 = smov 114  }
 0x328   : > { %728 = vrot.lane.b32.xlu0 %v1974_v48, %s1707_s14  ;;  %730 = vrot.lane.b32.xlu2 %v1976_v49, %s1707_s14  ;;  %s1722_s14 = smov 112  }
 0x329   : > { %716 = vrot.lane.b32.xlu1 %v1976_v49, %s1706_s13  ;;  %s1721_s13 = smov 113  }
 0x330   : > { %744 = vrot.lane.b32.xlu0 %v1976_v49, %s1708_s20  ;;  %756 = vrot.lane.b32.xlu2 %v1974_v48, %s1709_s6 }
 0x331   : > { %742 = vrot.lane.b32.xlu1 %v1974_v48, %s1708_s20  ;;  %s1723_s20 = smov 111  }
 0x338   : > { %770 = vrot.lane.b32.xlu0 %v1974_v48, %s1710_s7  ;;  %772 = vrot.lane.b32.xlu2 %v1976_v49, %s1710_s7 }
 0x339   : > { %758 = vrot.lane.b32.xlu1 %v1976_v49, %s1709_s6  ;;  %s1724_s6 = smov 110  }
 0x33a   : > { %v547_v50 = vpop.permute.xlu2 %546 }
 0x340   : > { %786 = vrot.lane.b32.xlu0 %v1976_v49, %s1711_s21  ;;  %798 = vrot.lane.b32.xlu2 %v1974_v48, %s1712_s26 }
 0x341   : > { %784 = vrot.lane.b32.xlu1 %v1974_v48, %s1711_s21  ;;  %s1725_s21 = smov 109  }
 0x342   : > { %v563_v51 = vpop.permute.xlu2 %562 }
 0x348   : > { %812 = vrot.lane.b32.xlu0 %v1974_v48, %s1713_s30  ;;  %814 = vrot.lane.b32.xlu2 %v1976_v49, %s1713_s30  ;;  %s1727_s30 = smov 98  }
 0x349   : > { %800 = vrot.lane.b32.xlu1 %v1976_v49, %s1712_s26  ;;  %s1726_s26 = smov 99  }
 0x34a   : > { %v589_v53 = vpop.permute.xlu2 %588 }
 0x350   : > { %828 = vrot.lane.b32.xlu0 %v1976_v49, %s1714_s5  ;;  %840 = vrot.lane.b32.xlu2 %v1974_v48, %s1715_s23 }
 0x351   : > { %826 = vrot.lane.b32.xlu1 %v1974_v48, %s1714_s5  ;;  %s1728_s5 = smov 97  }
 0x352   : > { %v534_v55 = vpop.permute.xlu0 %533  ;;  %v605_v56 = vpop.permute.xlu2 %604 }
 0x353   : > { %v532_v57 = vpop.permute.xlu1 %531 }
 0x354   : > { %v538_v58 = vsel %vm537_vm7, %v532_v57, %v534_v55  ;;  %v539_v59 = vsel %vm537_vm7, %v534_v55, %v532_v57  ;;  %vm774_vm7 = vcmp.lt.s32.totalorder %v2022_v54, 16 }
 0x355   : > { %v542_v35 = vmul.f32 %v540_v16, %v539_v59  ;;  %v543_v36 = vmul.f32 %v541_v21, %v538_v58  ;;  %v639_v16 = vld [vmem:[#allocation5 + $0x78] sm:$0x3] }
 0x358   : > { %854 = vrot.lane.b32.xlu0 %v1974_v48, %s1716_s25  ;;  %856 = vrot.lane.b32.xlu2 %v1976_v49, %s1716_s25  ;;  %s1730_s25 = smov 95  }
 0x359   : > { %842 = vrot.lane.b32.xlu1 %v1976_v49, %s1715_s23  ;;  %s1729_s23 = smov 96  }
 0x35a   : > { %v561_v6 = vpop.permute.xlu0 %560  ;;  %v2033_v11 = vpop.permute.xlu2 %630 }
 0x35b   : > { %v2035_v7 = vsel %vm564_vm8, %v561_v6, %v563_v51  ;;  %v2037_v8 = vsel %vm564_vm8, %v563_v51, %v561_v6  ;;  %v549_v9 = vpop.permute.xlu1 %548  ;;  %vm760_vm8 = vcmp.lt.s32.totalorder %v2022_v54, 17 }
 0x35c   : > { %v551_v10 = vsel %vm550_vm9, %v547_v50, %v549_v9  ;;  %v552_v12 = vsel %vm550_vm9, %v549_v9, %v547_v50  ;;  %v625_v50 = vld [vmem:[#allocation5 + $0x68] sm:$0x3]  ;;  %v570_v55 = vmul.f32 %v568_v43, %v2037_v8  ;;  %v582_v9 = vld [vmem:[#allocation5 + $0x30] sm:$0x3]  ;;  %v695_v43 = vld [vmem:[#allocation5 + $0xb8] sm:$0x3] }
 0x35d   : > { %v556_v26 = vmul.f32 %v554_v17, %v552_v12  ;;  %v557_v27 = vmul.f32 %v555_v18, %v551_v10  ;;  %v652_v10 = vld [vmem:[#allocation5 + $0x80] sm:$0x3]  ;;  %v653_v8 = vld [vmem:[#allocation5 + $0x88] sm:$0x3]  ;;  %vm788_vm9 = vcmp.lt.s32.totalorder %v2022_v54, 15 }
 0x360   : > { %877 = vrot.lane.b32.xlu0 %v1976_v49, %s1690_s12  ;;  %889 = vrot.lane.b32.xlu2 %v1974_v48, %s1717_s27 }
 0x361   : > { %875 = vrot.lane.b32.xlu1 %v1974_v48, %s1690_s12  ;;  %s1719_s12 = smov 115  }
 0x362   : > { %v577_v13 = vpop.permute.xlu0 %576  ;;  %v2045_v14 = vpop.permute.xlu2 %646 }
 0x363   : > { %v575_v2 = vpop.permute.xlu1 %574 }
 0x364   : > { %v2047_v15 = vsel %vm578_vm10, %v575_v2, %v577_v13  ;;  %v2049_v5 = vsel %vm578_vm10, %v577_v13, %v575_v2  ;;  %v638_v2 = vld [vmem:[#allocation5 + $0x70] sm:$0x3]  ;;  %vm816_vm10 = vcmp.lt.s32.totalorder %v2022_v54, 13 }
 0x368   : > { %903 = vrot.lane.b32.xlu0 %v1974_v48, %s1718_s28  ;;  %905 = vrot.lane.b32.xlu2 %v1976_v49, %s1718_s28  ;;  %s1732_s28 = smov 93  }
 0x369   : > { %891 = vrot.lane.b32.xlu1 %v1976_v49, %s1717_s27  ;;  %s1731_s27 = smov 94  }
 0x36a   : > { %v603_v22 = vpop.permute.xlu0 %602  ;;  %v2056_v23 = vpop.permute.xlu2 %672 }
 0x36b   : > { %v607_v28 = vsel %vm606_vm11, %v603_v22, %v605_v56  ;;  %v608_v29 = vsel %vm606_vm11, %v605_v56, %v603_v22  ;;  %v591_v30 = vpop.permute.xlu1 %590  ;;  %v571_v56 = vmul.f32 %v569_v44, %v2035_v7  ;;  %v583_v7 = vld [vmem:[#allocation5 + $0x38] sm:$0x3]  ;;  %vm802_vm11 = vcmp.lt.s32.totalorder %v2022_v54, 14 }
 0x36c   : > { %v612_v31 = vmul.f32 %v610_v19, %v608_v29  ;;  %v613_v32 = vmul.f32 %v611_v20, %v607_v28  ;;  %v593_v33 = vsel %vm592_vm12, %v589_v53, %v591_v30  ;;  %v594_v34 = vsel %vm592_vm12, %v591_v30, %v589_v53 }
 0x36d   : > { %v598_v37 = vmul.f32 %v596_v24, %v594_v34  ;;  %v599_v38 = vmul.f32 %v597_v25, %v593_v33  ;;  %v584_v25 = vmul.f32 %v582_v9, %v2049_v5  ;;  %v667_v5 = vld [vmem:[#allocation5 + $0x98] sm:$0x3]  ;;  %vm830_vm12 = vcmp.lt.s32.totalorder %v2022_v54, 3 }
 0x36e   : > { %v2058_v39 = vadd.f32 %v612_v31, %v556_v26  ;;  %v2060_v40 = vadd.f32 %v613_v32, %v557_v27  ;;  %v585_v26 = vmul.f32 %v583_v7, %v2047_v15  ;;  %v666_v15 = vld [vmem:[#allocation5 + $0x90] sm:$0x3] }
 0x36f   : > { %v600_v41 = vadd.f32 %v598_v37, %v542_v35  ;;  %v601_v42 = vadd.f32 %v599_v38, %v543_v36 }
 0x370   : > { %919 = vrot.lane.b32.xlu0 %v1976_v49, %s1719_s12  ;;  %931 = vrot.lane.b32.xlu2 %v1974_v48, %s1720_s11 }
 0x371   : > { %917 = vrot.lane.b32.xlu1 %v1974_v48, %s1719_s12  ;;  %s1733_s12 = smov 83  }
 0x372   : > { %v619_v45 = vpop.permute.xlu0 %618  ;;  %v2066_v46 = vpop.permute.xlu2 %688 }
 0x373   : > { %v617_v51 = vpop.permute.xlu1 %616 }
 0x374   : > { %v621_v52 = vsel %vm620_vm13, %v617_v51, %v619_v45  ;;  %v622_v53 = vsel %vm620_vm13, %v619_v45, %v617_v51  ;;  %vm858_vm13 = vcmp.lt.s32.totalorder %v2022_v54, 1 }
 0x375   : > { %v626_v57 = vmul.f32 %v624_v47, %v622_v53  ;;  %v627_v58 = vmul.f32 %v625_v50, %v621_v52  ;;  %v681_v47 = vld [vmem:[#allocation5 + $0xa8] sm:$0x3] }
 0x377   : > { %v2070_v59 = vadd.f32 %v626_v57, %v570_v55  ;;  %v2072_v6 = vadd.f32 %v627_v58, %v571_v56 }
 0x378   : > { %945 = vrot.lane.b32.xlu0 %v1974_v48, %s1721_s13  ;;  %947 = vrot.lane.b32.xlu2 %v1976_v49, %s1721_s13  ;;  %s1735_s13 = smov 81  }
 0x379   : > { %933 = vrot.lane.b32.xlu1 %v1976_v49, %s1720_s11  ;;  %s1734_s11 = smov 82  }
 0x37a   : > { %v645_v12 = vpop.permute.xlu0 %644  ;;  %v2079_v13 = vpop.permute.xlu2 %714 }
 0x37b   : > { %v649_v17 = vsel %vm648_vm14, %v645_v12, %v2045_v14  ;;  %v650_v18 = vsel %vm648_vm14, %v2045_v14, %v645_v12  ;;  %v633_v19 = vpop.permute.xlu1 %632  ;;  %v708_v12 = vld [vmem:[#allocation5 + $0xc0] sm:$0x3]  ;;  %vm844_vm14 = vcmp.lt.s32.totalorder %v2022_v54, 2 }
 0x37c   : > { %v654_v20 = vmul.f32 %v652_v10, %v650_v18  ;;  %v655_v21 = vmul.f32 %v653_v8, %v649_v17  ;;  %v635_v22 = vsel %vm634_vm15, %v2033_v11, %v633_v19  ;;  %v636_v24 = vsel %vm634_vm15, %v633_v19, %v2033_v11 }
 0x37d   : > { %v640_v27 = vmul.f32 %v638_v2, %v636_v24  ;;  %v641_v28 = vmul.f32 %v639_v16, %v635_v22  ;;  %v709_v2 = vld [vmem:[#allocation5 + $0xc8] sm:$0x3]  ;;  %vm879_vm15 = vcmp.lt.s32.totalorder %v2022_v54, 127 }
 0x37e   : > { %v656_v29 = vadd.f32 %v654_v20, %v600_v41  ;;  %v657_v30 = vadd.f32 %v655_v21, %v601_v42  ;;  %v694_v42 = vld [vmem:[#allocation5 + $0xb0] sm:$0x3]  ;;  %v736_v21 = vld [vmem:[#allocation5 + $0xe0] sm:$0x3]  ;;  %v737_v22 = vld [vmem:[#allocation5 + $0xe8] sm:$0x3] }
 0x37f   : > { %v642_v31 = vadd.f32 %v640_v27, %v584_v25  ;;  %v643_v32 = vadd.f32 %v641_v28, %v585_v26  ;;  %v722_v26 = vld [vmem:[#allocation5 + $0xd0] sm:$0x3]  ;;  %v723_v27 = vld [vmem:[#allocation5 + $0xd8] sm:$0x3] }
 0x380   : > { %961 = vrot.lane.b32.xlu0 %v1976_v49, %s1722_s14  ;;  %973 = vrot.lane.b32.xlu2 %v1974_v48, %s1723_s20 }
 0x381   : > { %959 = vrot.lane.b32.xlu1 %v1974_v48, %s1722_s14  ;;  %s1736_s14 = smov 80  }
 0x382   : > { %v661_v11 = vpop.permute.xlu0 %660  ;;  %v2091_v14 = vpop.permute.xlu2 %730 }
 0x383   : > { %v659_v33 = vpop.permute.xlu1 %658 }
 0x384   : > { %v663_v34 = vsel %vm662_vm0, %v659_v33, %v661_v11  ;;  %v664_v35 = vsel %vm662_vm0, %v661_v11, %v659_v33  ;;  %vm907_vm0 = vcmp.lt.s32.totalorder %v2022_v54, 125 }
 0x385   : > { %v668_v36 = vmul.f32 %v666_v15, %v664_v35  ;;  %v669_v37 = vmul.f32 %v667_v5, %v663_v34 }
 0x387   : > { %v2094_v38 = vadd.f32 %v668_v36, %v2058_v39  ;;  %v2097_v41 = vadd.f32 %v669_v37, %v2060_v40  ;;  %v680_v39 = vld [vmem:[#allocation5 + $0xa0] sm:$0x3] }
 0x388   : > { %987 = vrot.lane.b32.xlu0 %v1974_v48, %s1724_s6  ;;  %989 = vrot.lane.b32.xlu2 %v1976_v49, %s1724_s6  ;;  %s1738_s6 = smov 78  }
 0x389   : > { %975 = vrot.lane.b32.xlu1 %v1976_v49, %s1723_s20  ;;  %s1737_s20 = smov 79  }
 0x38a   : > { %v687_v44 = vpop.permute.xlu0 %686  ;;  %v2104_v45 = vpop.permute.xlu2 %756 }
 0x38b   : > { %v691_v40 = vsel %vm690_vm1, %v687_v44, %v2066_v46  ;;  %v692_v50 = vsel %vm690_vm1, %v2066_v46, %v687_v44  ;;  %v675_v51 = vpop.permute.xlu1 %674  ;;  %vm893_vm1 = vcmp.lt.s32.totalorder %v2022_v54, 126 }
 0x38c   : > { %v696_v52 = vmul.f32 %v694_v42, %v692_v50  ;;  %v697_v53 = vmul.f32 %v695_v43, %v691_v40  ;;  %v677_v55 = vsel %vm676_vm2, %v2056_v23, %v675_v51  ;;  %v678_v56 = vsel %vm676_vm2, %v675_v51, %v2056_v23  ;;  %v750_v42 = vld [vmem:[#allocation5 + $0xf0] sm:$0x3]  ;;  %v751_v43 = vld [vmem:[#allocation5 + $0xf8] sm:$0x3] }
 0x38d   : > { %v682_v57 = vmul.f32 %v680_v39, %v678_v56  ;;  %v683_v58 = vmul.f32 %v681_v47, %v677_v55  ;;  %v778_v51 = vld [vmem:[#allocation5 + $0x110] sm:$0x3]  ;;  %v764_v56 = vld [vmem:[#allocation5 + $0x100] sm:$0x3]  ;;  %vm921_vm2 = vcmp.lt.s32.totalorder %v2022_v54, 115 }
 0x38e   : > { %v698_v9 = vadd.f32 %v696_v52, %v642_v31  ;;  %v699_v10 = vadd.f32 %v697_v53, %v643_v32  ;;  %v779_v52 = vld [vmem:[#allocation5 + $0x118] sm:$0x3] }
 0x38f   : > { %v684_v8 = vadd.f32 %v682_v57, %v2070_v59  ;;  %v685_v7 = vadd.f32 %v683_v58, %v2072_v6  ;;  %v765_v57 = vld [vmem:[#allocation5 + $0x108] sm:$0x3] }
 0x390   : > { %1003 = vrot.lane.b32.xlu0 %v1976_v49, %s1725_s21  ;;  %1015 = vrot.lane.b32.xlu2 %v1974_v48, %s1726_s26 }
 0x391   : > { %1001 = vrot.lane.b32.xlu1 %v1974_v48, %s1725_s21  ;;  %s1739_s21 = smov 77  }
 0x392   : > { %v703_v46 = vpop.permute.xlu0 %702  ;;  %v2116_v23 = vpop.permute.xlu2 %772 }
 0x393   : > { %v701_v16 = vpop.permute.xlu1 %700 }
 0x394   : > { %v705_v17 = vsel %vm704_vm3, %v701_v16, %v703_v46  ;;  %v706_v59 = vsel %vm704_vm3, %v703_v46, %v701_v16  ;;  %vm949_vm3 = vcmp.lt.s32.totalorder %v2022_v54, 113 }
 0x395   : > { %v710_v18 = vmul.f32 %v708_v12, %v706_v59  ;;  %v711_v6 = vmul.f32 %v709_v2, %v705_v17 }
 0x397   : > { %v2118_v19 = vadd.f32 %v710_v18, %v656_v29  ;;  %v2120_v20 = vadd.f32 %v711_v6, %v657_v30 }
 0x398   : > { %1029 = vrot.lane.b32.xlu0 %v1974_v48, %s1727_s30  ;;  %1031 = vrot.lane.b32.xlu2 %v1976_v49, %s1727_s30 }
 0x399   : > { %1017 = vrot.lane.b32.xlu1 %v1976_v49, %s1726_s26  ;;  %s1409_s26 = sshll.u32 %s1787_s19, 6 }
 0x39a   : > { %v729_v24 = vpop.permute.xlu0 %728  ;;  %v2127_v25 = vpop.permute.xlu2 %798 }
 0x39b   : > { %v733_v28 = vsel %vm732_vm4, %v729_v24, %v2091_v14  ;;  %v734_v29 = vsel %vm732_vm4, %v2091_v14, %v729_v24  ;;  %v717_v30 = vpop.permute.xlu1 %716  ;;  %vm935_vm4 = vcmp.lt.s32.totalorder %v2022_v54, 114 }
 0x39c   : > { %v738_v31 = vmul.f32 %v736_v21, %v734_v29  ;;  %v739_v32 = vmul.f32 %v737_v22, %v733_v28  ;;  %v719_v11 = vsel %vm718_vm5, %v2079_v13, %v717_v30  ;;  %v720_v15 = vsel %vm718_vm5, %v717_v30, %v2079_v13  ;;  %v792_v21 = vld [vmem:[#allocation5 + $0x120] sm:$0x3]  ;;  %v793_v22 = vld [vmem:[#allocation5 + $0x128] sm:$0x3] }
 0x39d   : > { %v724_v5 = vmul.f32 %v722_v26, %v720_v15  ;;  %v725_v33 = vmul.f32 %v723_v27, %v719_v11  ;;  %v820_v30 = vld [vmem:[#allocation5 + $0x140] sm:$0x3]  ;;  %v806_v15 = vld [vmem:[#allocation5 + $0x130] sm:$0x3]  ;;  %vm963_vm5 = vcmp.lt.s32.totalorder %v2022_v54, 112 }
 0x39e   : > { %v740_v34 = vadd.f32 %v738_v31, %v684_v8  ;;  %v741_v35 = vadd.f32 %v739_v32, %v685_v7  ;;  %v821_v31 = vld [vmem:[#allocation5 + $0x148] sm:$0x3] }
 0x39f   : > { %v726_v36 = vadd.f32 %v724_v5, %v2094_v38  ;;  %v727_v37 = vadd.f32 %v725_v33, %v2097_v41  ;;  %v807_v5 = vld [vmem:[#allocation5 + $0x138] sm:$0x3] }
 0x3a0   : > { %1045 = vrot.lane.b32.xlu0 %v1976_v49, %s1728_s5  ;;  %1057 = vrot.lane.b32.xlu2 %v1974_v48, %s1729_s23 }
 0x3a1   : > { %1043 = vrot.lane.b32.xlu1 %v1974_v48, %s1728_s5 }
 0x3a2   : > { %v745_v14 = vpop.permute.xlu0 %744  ;;  %v2139_v13 = vpop.permute.xlu2 %814 }
 0x3a3   : > { %v743_v44 = vpop.permute.xlu1 %742 }
 0x3a4   : > { %v747_v39 = vsel %vm746_vm6, %v743_v44, %v745_v14  ;;  %v748_v38 = vsel %vm746_vm6, %v745_v14, %v743_v44  ;;  %vm991_vm6 = vcmp.lt.s32.totalorder %v2022_v54, 110 }
 0x3a5   : > { %v752_v47 = vmul.f32 %v750_v42, %v748_v38  ;;  %v753_v41 = vmul.f32 %v751_v43, %v747_v39 }
 0x3a7   : > { %v2141_v40 = vadd.f32 %v752_v47, %v698_v9  ;;  %v2143_v50 = vadd.f32 %v753_v41, %v699_v10 }
 0x3a8   : > { %1071 = vrot.lane.b32.xlu0 %v1974_v48, %s1730_s25  ;;  %1073 = vrot.lane.b32.xlu2 %v1976_v49, %s1730_s25  ;;  %s234_s25 = scalar_lea.vmem [#allocation7], %s1388_s24  ;;  %s1282_s24 = scalar_lea.sflag [#allocation4], %s1865_s10 }
 0x3a9   : > { %1059 = vrot.lane.b32.xlu1 %v1976_v49, %s1729_s23  ;;  %s1293_s23 = scalar_lea.hbm %s2397_s4, %s1409_s26  ;;  %s1294_s19 = sshll.u32 %s234_s25, 4  ;;  %s1295_s19 = int_to_ptr.vmem [resolvable:$true] %s1294_s19 }
 0x3aa   : > { %v771_v53 = vpop.permute.xlu0 %770  ;;  %v2150_v55 = vpop.permute.xlu2 %840 }
 0x3ab   : > { %v775_v58 = vsel %vm774_vm7, %v771_v53, %v2116_v23  ;;  %v776_v9 = vsel %vm774_vm7, %v2116_v23, %v771_v53  ;;  %v759_v10 = vpop.permute.xlu1 %758  ;;  %vm977_vm7 = vcmp.lt.s32.totalorder %v2022_v54, 111 }
 0x3ac   : > { %v780_v8 = vmul.f32 %v778_v51, %v776_v9  ;;  %v781_v7 = vmul.f32 %v779_v52, %v775_v58  ;;  %v761_v46 = vsel %vm760_vm8, %v2104_v45, %v759_v10  ;;  %v762_v12 = vsel %vm760_vm8, %v759_v10, %v2104_v45  ;;  %v834_v51 = vld [vmem:[#allocation5 + $0x150] sm:$0x3]  ;;  %v835_v52 = vld [vmem:[#allocation5 + $0x158] sm:$0x3] }
 0x3ad   : > { %v766_v2 = vmul.f32 %v764_v56, %v762_v12  ;;  %v767_v16 = vmul.f32 %v765_v57, %v761_v46  ;;  %v862_v10 = vld [vmem:[#allocation5 + $0x170] sm:$0x3]  ;;  %v848_v12 = vld [vmem:[#allocation5 + $0x160] sm:$0x3]  ;;  %vm1005_vm8 = vcmp.lt.s32.totalorder %v2022_v54, 109 }
 0x3ae   : > { %v782_v17 = vadd.f32 %v780_v8, %v726_v36  ;;  %v783_v59 = vadd.f32 %v781_v7, %v727_v37  ;;  %v863_v8 = vld [vmem:[#allocation5 + $0x178] sm:$0x3] }
 0x3af   : > { %v768_v18 = vadd.f32 %v766_v2, %v2118_v19  ;;  %v769_v6 = vadd.f32 %v767_v16, %v2120_v20  ;;  %v849_v2 = vld [vmem:[#allocation5 + $0x168] sm:$0x3] }
 0x3b0   : > { %1087 = vrot.lane.b32.xlu0 %v1976_v49, %s1731_s27  ;;  %1099 = vrot.lane.b32.xlu2 %v1974_v48, %s1732_s28 }
 0x3b1   : > { %1085 = vrot.lane.b32.xlu1 %v1974_v48, %s1731_s27  ;;  %s1296_s27 = sshll.u32 %s1293_s23, 4  ;;  %s1297_s27 = int_to_ptr.hbm [resolvable:$true] %s1296_s27 }
 0x3b2   : > { %v787_v23 = vpop.permute.xlu0 %786  ;;  %v2162_v45 = vpop.permute.xlu2 %856 }
 0x3b3   : > { %v785_v24 = vpop.permute.xlu1 %784 }
 0x3b4   : > { %v789_v26 = vsel %vm788_vm9, %v785_v24, %v787_v23  ;;  %v790_v19 = vsel %vm788_vm9, %v787_v23, %v785_v24  ;;  %vm1019_vm9 = vcmp.lt.s32.totalorder %v2022_v54, 99 }
 0x3b5   : > { %v794_v27 = vmul.f32 %v792_v21, %v790_v19  ;;  %v795_v20 = vmul.f32 %v793_v22, %v789_v26 }
 0x3b7   : > { %v2164_v28 = vadd.f32 %v794_v27, %v740_v34  ;;  %v2166_v29 = vadd.f32 %v795_v20, %v741_v35 }
 0x3b8   : > { %1113 = vrot.lane.b32.xlu0 %v1974_v48, %s1733_s12  ;;  %1115 = vrot.lane.b32.xlu2 %v1976_v49, %s1733_s12 }
 0x3b9   : > { %1101 = vrot.lane.b32.xlu1 %v1976_v49, %s1732_s28  ;;  %s1628_s28 = sshra.s32 %s1297_s27, 4  ;;  %s1629_s28 = int_to_ptr.hbm [resolvable:$true] %s1628_s28 }
 0x3ba   : > { %v813_v32 = vpop.permute.xlu0 %812  ;;  %v2173_v11 = vpop.permute.xlu2 %889  ;;  %s1630_s12 = scalar_lea.hbm %s1629_s28, 64  ;;  %p1635_p11 = scmp.lt.s32.totalorder %s1629_s28, %s2397_s4 }
 0x3bb   : > { %v817_v33 = vsel %vm816_vm10, %v813_v32, %v2139_v13  ;;  %v818_v34 = vsel %vm816_vm10, %v2139_v13, %v813_v32  ;;  %v801_v35 = vpop.permute.xlu1 %800  ;;  %vm1033_vm10 = vcmp.lt.s32.totalorder %v2022_v54, 98  ;;  %p1631_p1 = scmp.ne.s32.totalorder %s1629_s28, %s1630_s12 }
 0x3bc   : > { %v822_v36 = vmul.f32 %v820_v30, %v818_v34  ;;  %v823_v37 = vmul.f32 %v821_v31, %v817_v33  ;;  %v803_v14 = vsel %vm802_vm11, %v2127_v25, %v801_v35  ;;  %v804_v42 = vsel %vm802_vm11, %v801_v35, %v2127_v25  ;;  %v883_v30 = vld [vmem:[#allocation5 + $0x190] sm:$0x3]  ;;  %v884_v31 = vld [vmem:[#allocation5 + $0x198] sm:$0x3] }
 0x3bd   : > { %v808_v43 = vmul.f32 %v806_v15, %v804_v42  ;;  %v809_v44 = vmul.f32 %v807_v5, %v803_v14  ;;  %v911_v35 = vld [vmem:[#allocation5 + $0x1b0] sm:$0x3]  ;;  %v897_v14 = vld [vmem:[#allocation5 + $0x1a0] sm:$0x3]  ;;  %v898_v42 = vld [vmem:[#allocation5 + $0x1a8] sm:$0x3]  ;;  %p1632_p4 = pnand %p1631_p1, %p1835_p3 }
 0x3be   : > { %v2179_v39 = vadd.f32 %v822_v36, %v768_v18  ;;  %v2181_v38 = vadd.f32 %v823_v37, %v769_v6  ;;  %v912_v36 = vld [vmem:[#allocation5 + $0x1b8] sm:$0x3]  ;;  %vm1047_vm11 = vcmp.lt.s32.totalorder %v2022_v54, 97 }
 0x3bf   : > { %v810_v47 = vadd.f32 %v808_v43, %v2141_v40  ;;  %v811_v41 = vadd.f32 %v809_v44, %v2143_v50  ;;  %p1633_p8 = pneg %p1632_p4 }
 0x3c0   : > { %1129 = vrot.lane.b32.xlu0 %v1976_v49, %s1734_s11  ;;  %1141 = vrot.lane.b32.xlu2 %v1974_v48, %s1735_s13 }
 0x3c1   : > { %1127 = vrot.lane.b32.xlu1 %v1974_v48, %s1734_s11 }
 0x3c2   : > { %v829_v25 = vpop.permute.xlu0 %828  ;;  %v2189_v13 = vpop.permute.xlu2 %905 }
 0x3c3   : > { %v827_v53 = vpop.permute.xlu1 %826 }
 0x3c4   : > { %v831_v56 = vsel %vm830_vm12, %v827_v53, %v829_v25  ;;  %v832_v40 = vsel %vm830_vm12, %v829_v25, %v827_v53  ;;  %vm1075_vm12 = vcmp.lt.s32.totalorder %v2022_v54, 95 }
 0x3c5   : > { %v836_v57 = vmul.f32 %v834_v51, %v832_v40  ;;  %v837_v50 = vmul.f32 %v835_v52, %v831_v56 }
 0x3c7   : > { %v838_v58 = vadd.f32 %v836_v57, %v782_v17  ;;  %v839_v9 = vadd.f32 %v837_v50, %v783_v59 }
 0x3c8   : > { %1155 = vrot.lane.b32.xlu0 %v1974_v48, %s1736_s14  ;;  %1157 = vrot.lane.b32.xlu2 %v1976_v49, %s1736_s14  ;;  %s1634_s14 = scalar_lea.hbm %s2397_s4, 128 }
 0x3c9   : > { %1143 = vrot.lane.b32.xlu1 %v1976_v49, %s1735_s13  ;;  %p1636_p9 = scmp.lt.s32.totalorder %s1634_s14, %s1630_s12 }
 0x3ca   : > { %v855_v7 = vpop.permute.xlu0 %854  ;;  %v2196_v46 = vpop.permute.xlu2 %931 }
 0x3cb   : > { %v859_v16 = vsel %vm858_vm13, %v855_v7, %v2162_v45  ;;  %v860_v17 = vsel %vm858_vm13, %v2162_v45, %v855_v7  ;;  %v843_v59 = vpop.permute.xlu1 %842  ;;  %v925_v7 = vld [vmem:[#allocation5 + $0x1c0] sm:$0x3]  ;;  %vm1061_vm13 = vcmp.lt.s32.totalorder %v2022_v54, 96  ;;  %p1637_p2 = por %p1636_p9, %p1635_p11 }
 0x3cc   : > { %v864_v18 = vmul.f32 %v862_v10, %v860_v17  ;;  %v865_v6 = vmul.f32 %v863_v8, %v859_v16  ;;  %v845_v23 = vsel %vm844_vm14, %v2150_v55, %v843_v59  ;;  %v846_v21 = vsel %vm844_vm14, %v843_v59, %v2150_v55  ;;  %v869_v10 = vld [vmem:[#allocation5 + $0x180] sm:$0x3]  ;;  %v870_v8 = vld [vmem:[#allocation5 + $0x188] sm:$0x3] }
 0x3cd   : > { %v850_v22 = vmul.f32 %v848_v12, %v846_v21  ;;  %v851_v24 = vmul.f32 %v849_v2, %v845_v23  ;;  %v926_v12 = vld [vmem:[#allocation5 + $0x1c8] sm:$0x3]  ;;  %v872_v2 = vmul.f32 %v870_v8, %v1976_v49  ;;  %v871_v17 = vmul.f32 %v869_v10, %v1974_v48  ;;  %p1638_p10 = pnand %p1637_p2, %p1633_p8 }
 0x3ce   : > { %v866_v26 = vadd.f32 %v864_v18, %v810_v47  ;;  %v867_v19 = vadd.f32 %v865_v6, %v811_v41  ;;  %vm1089_vm14 = vcmp.lt.s32.totalorder %v2022_v54, 94 }
 0x3cf   : > { %v852_v27 = vadd.f32 %v850_v22, %v2164_v28  ;;  %v853_v20 = vadd.f32 %v851_v24, %v2166_v29  ;;  %v874_v18 = vadd.f32 %v872_v2, %v2181_v38  ;;  %v873_v6 = vadd.f32 %v871_v17, %v2179_v39 }
 0x3d0   : > { %1171 = vrot.lane.b32.xlu0 %v1976_v49, %s1737_s20  ;;  %1183 = vrot.lane.b32.xlu2 %v1974_v48, %s1738_s6 }
 0x3d1   : > { %1169 = vrot.lane.b32.xlu1 %v1974_v48, %s1737_s20 }
 0x3d2   : > { %v878_v45 = vpop.permute.xlu0 %877  ;;  %v948_v55 = vpop.permute.xlu2 %947 }
 0x3d3   : > { %v876_v32 = vpop.permute.xlu1 %875 }
 0x3d4   : > { %v880_v15 = vsel %vm879_vm15, %v876_v32, %v878_v45  ;;  %v881_v5 = vsel %vm879_vm15, %v878_v45, %v876_v32  ;;  %vm1117_vm15 = vcmp.lt.s32.totalorder %v2022_v54, 83 }
 0x3d5   : > { %v885_v28 = vmul.f32 %v883_v30, %v880_v15  ;;  %v886_v33 = vmul.f32 %v884_v31, %v881_v5 }
 0x3d7   : > { %v2208_v29 = vadd.f32 %v885_v28, %v838_v58  ;;  %v2210_v34 = vadd.f32 %v886_v33, %v839_v9 }
 0x3d8   : > { %1197 = vrot.lane.b32.xlu0 %v1974_v48, %s1739_s21  ;;  %1199 = vrot.lane.b32.xlu2 %v1976_v49, %s1739_s21  ;;  %v940_v48 = vld [vmem:[#allocation5 + $0x1d8] sm:$0x3] }
 0x3d9   : > { %1185 = vrot.lane.b32.xlu1 %v1976_v49, %s1738_s6 }
 0x3da   : > { %v904_v37 = vpop.permute.xlu0 %903  ;;  %v2219_v51 = vpop.permute.xlu2 %973 }
 0x3db   : > { %v908_v43 = vsel %vm907_vm0, %v904_v37, %v2189_v13  ;;  %v909_v44 = vsel %vm907_vm0, %v2189_v13, %v904_v37  ;;  %v892_v47 = vpop.permute.xlu1 %891  ;;  %vm1103_vm0 = vcmp.lt.s32.totalorder %v2022_v54, 93 }
 0x3dc   : > { %v913_v41 = vmul.f32 %v911_v35, %v908_v43  ;;  %v914_v25 = vmul.f32 %v912_v36, %v909_v44  ;;  %v894_v52 = vsel %vm893_vm1, %v2173_v11, %v892_v47  ;;  %v895_v53 = vsel %vm893_vm1, %v892_v47, %v2173_v11  ;;  %v968_v43 = vld [vmem:[#allocation5 + $0x1f8] sm:$0x3] }
 0x3dd   : > { %v899_v56 = vmul.f32 %v897_v14, %v894_v52  ;;  %v900_v40 = vmul.f32 %v898_v42, %v895_v53  ;;  %vm1131_vm1 = vcmp.lt.s32.totalorder %v2022_v54, 82 }
 0x3de   : > { %v915_v57 = vadd.f32 %v913_v41, %v866_v26  ;;  %v916_v50 = vadd.f32 %v914_v25, %v867_v19  ;;  %v953_v19 = vld [vmem:[#allocation5 + $0x1e0] sm:$0x3] }
 0x3df   : > { %v901_v58 = vadd.f32 %v899_v56, %v852_v27  ;;  %v902_v9 = vadd.f32 %v900_v40, %v853_v20  ;;  %v954_v27 = vld [vmem:[#allocation5 + $0x1e8] sm:$0x3]  ;;  %v939_v20 = vld [vmem:[#allocation5 + $0x1d0] sm:$0x3]  ;;  %v996_v40 = vld [vmem:[#allocation5 + $0x218] sm:$0x3] }
 0x3e0   : > { %v995_v56 = vld [vmem:[#allocation5 + $0x210] sm:$0x3] }
 0x3e2   : > { %v920_v13 = vpop.permute.xlu0 %919  ;;  %v990_v22 = vpop.permute.xlu2 %989 }
 0x3e3   : > { %v918_v16 = vpop.permute.xlu1 %917 }
 0x3e4   : > { %v922_v59 = vsel %vm921_vm2, %v918_v16, %v920_v13  ;;  %v923_v11 = vsel %vm921_vm2, %v920_v13, %v918_v16  ;;  %vm1145_vm2 = vcmp.lt.s32.totalorder %v2022_v54, 81 }
 0x3e5   : > { %v927_v23 = vmul.f32 %v925_v7, %v922_v59  ;;  %v928_v21 = vmul.f32 %v926_v12, %v923_v11 }
 0x3e7   : > { %v929_v24 = vadd.f32 %v927_v23, %v873_v6  ;;  %v930_v26 = vadd.f32 %v928_v21, %v874_v18  ;;  %v1009_v23 = vld [vmem:[#allocation5 + $0x220] sm:$0x3]  ;;  %v1010_v21 = vld [vmem:[#allocation5 + $0x228] sm:$0x3] }
 0x3ea   : > { %v946_v49 = vpop.permute.xlu0 %945  ;;  %v1016_v14 = vpop.permute.xlu2 %1015 }
 0x3eb   : > { %v950_v45 = vsel %vm949_vm3, %v946_v49, %v948_v55  ;;  %v951_v30 = vsel %vm949_vm3, %v948_v55, %v946_v49  ;;  %v934_v31 = vpop.permute.xlu1 %933  ;;  %v967_v55 = vld [vmem:[#allocation5 + $0x1f0] sm:$0x3]  ;;  %vm1159_vm3 = vcmp.lt.s32.totalorder %v2022_v54, 80 }
 0x3ec   : > { %v955_v38 = vmul.f32 %v953_v19, %v950_v45  ;;  %v956_v32 = vmul.f32 %v954_v27, %v951_v30  ;;  %v936_v39 = vsel %vm935_vm4, %v2196_v46, %v934_v31  ;;  %v937_v15 = vsel %vm935_vm4, %v934_v31, %v2196_v46  ;;  %v1024_v30 = vld [vmem:[#allocation5 + $0x238] sm:$0x3] }
 0x3ed   : > { %v941_v5 = vmul.f32 %v939_v20, %v936_v39  ;;  %v942_v28 = vmul.f32 %v940_v48, %v937_v15  ;;  %vm1173_vm4 = vcmp.lt.s32.totalorder %v2022_v54, 79 }
 0x3ee   : > { %v957_v33 = vadd.f32 %v955_v38, %v901_v58  ;;  %v958_v35 = vadd.f32 %v956_v32, %v902_v9  ;;  %v981_v58 = vld [vmem:[#allocation5 + $0x200] sm:$0x3]  ;;  %v982_v9 = vld [vmem:[#allocation5 + $0x208] sm:$0x3] }
 0x3ef   : > { %v943_v36 = vadd.f32 %v941_v5, %v2208_v29  ;;  %v944_v37 = vadd.f32 %v942_v28, %v2210_v34 }
 0x3f2   : > { %v962_v42 = vpop.permute.xlu0 %961  ;;  %v1032_v29 = vpop.permute.xlu2 %1031 }
 0x3f3   : > { %v960_v44 = vpop.permute.xlu1 %959 }
 0x3f4   : > { %v964_v47 = vsel %vm963_vm5, %v960_v44, %v962_v42  ;;  %v965_v41 = vsel %vm963_vm5, %v962_v42, %v960_v44  ;;  %vm1201_vm5 = vcmp.lt.s32.totalorder %v2022_v54, 77 }
 0x3f5   : > { %v969_v25 = vmul.f32 %v967_v55, %v964_v47  ;;  %v970_v52 = vmul.f32 %v968_v43, %v965_v41 }
 0x3f7   : > { %v971_v46 = vadd.f32 %v969_v25, %v915_v57  ;;  %v972_v53 = vadd.f32 %v970_v52, %v916_v50 }
 0x3fa   : > { %v988_v34 = vpop.permute.xlu0 %987  ;;  %v1058_v19 = vpop.permute.xlu2 %1057 }
 0x3fb   : > { %v992_v10 = vsel %vm991_vm6, %v988_v34, %v990_v22  ;;  %v993_v8 = vsel %vm991_vm6, %v990_v22, %v988_v34  ;;  %v976_v13 = vpop.permute.xlu1 %975  ;;  %v1038_v34 = vld [vmem:[#allocation5 + $0x248] sm:$0x3]  ;;  %vm1187_vm6 = vcmp.lt.s32.totalorder %v2022_v54, 78 }
 0x3fc   : > { %v997_v7 = vmul.f32 %v995_v56, %v992_v10  ;;  %v998_v12 = vmul.f32 %v996_v40, %v993_v8  ;;  %v978_v2 = vsel %vm977_vm7, %v2219_v51, %v976_v13  ;;  %v979_v57 = vsel %vm977_vm7, %v976_v13, %v2219_v51  ;;  %v1052_v10 = vld [vmem:[#allocation5 + $0x258] sm:$0x3] }
 0x3fd   : > { %v983_v50 = vmul.f32 %v981_v58, %v978_v2  ;;  %v984_v16 = vmul.f32 %v982_v9, %v979_v57  ;;  %v1051_v9 = vld [vmem:[#allocation5 + $0x250] sm:$0x3] }
 0x3fe   : > { %v2239_v17 = vadd.f32 %v997_v7, %v943_v36  ;;  %v2241_v59 = vadd.f32 %v998_v12, %v944_v37  ;;  %v1079_v57 = vld [vmem:[#allocation5 + $0x270] sm:$0x3] }
 0x3ff   : > { %v2243_v11 = vadd.f32 %v983_v50, %v929_v24  ;;  %v2245_v18 = vadd.f32 %v984_v16, %v930_v26  ;;  %v1023_v26 = vld [vmem:[#allocation5 + $0x230] sm:$0x3] }
 0x402   : > { %v1004_v6 = vpop.permute.xlu0 %1003  ;;  %v1074_v5 = vpop.permute.xlu2 %1073 }
 0x403   : > { %v1002_v22 = vpop.permute.xlu1 %1001 }
 0x404   : > { %v1006_v27 = vsel %vm1005_vm8, %v1002_v22, %v1004_v6  ;;  %v1007_v49 = vsel %vm1005_vm8, %v1004_v6, %v1002_v22  ;;  %v1065_v22 = vld [vmem:[#allocation5 + $0x260] sm:$0x3] }
 0x405   : > { %v1011_v51 = vmul.f32 %v1009_v23, %v1006_v27  ;;  %v1012_v20 = vmul.f32 %v1010_v21, %v1007_v49  ;;  %v1080_v23 = vld [vmem:[#allocation5 + $0x278] sm:$0x3]  ;;  %v1066_v49 = vld [vmem:[#allocation5 + $0x268] sm:$0x3] }
 0x407   : > { %v2248_v48 = vadd.f32 %v1011_v51, %v957_v33  ;;  %v2250_v45 = vadd.f32 %v1012_v20, %v958_v35 }
 0x40a   : > { %v1030_v24 = vpop.permute.xlu0 %1029  ;;  %v2257_v42 = vpop.permute.xlu2 %1099 }
 0x40b   : > { %v1018_v31 = vpop.permute.xlu1 %1017  ;;  %v1034_v40 = vsel %vm1033_vm10, %v1030_v24, %v1032_v29  ;;  %v1035_v58 = vsel %vm1033_vm10, %v1032_v29, %v1030_v24 }
 0x40c   : > { %v1020_v38 = vsel %vm1019_vm9, %v1016_v14, %v1018_v31  ;;  %v1021_v32 = vsel %vm1019_vm9, %v1018_v31, %v1016_v14  ;;  %v1040_v2 = vmul.f32 %v1038_v34, %v1035_v58 }
 0x40d   : > { %v1025_v39 = vmul.f32 %v1023_v26, %v1020_v38  ;;  %v1026_v15 = vmul.f32 %v1024_v30, %v1021_v32  ;;  %v1093_v26 = vld [vmem:[#allocation5 + $0x280] sm:$0x3]  ;;  %v1094_v30 = vld [vmem:[#allocation5 + $0x288] sm:$0x3] }
 0x40e   : > { %v1042_v32 = vadd.f32 %v1040_v2, %v2245_v18 }
 0x40f   : > { %v2253_v28 = vadd.f32 %v1025_v39, %v971_v46  ;;  %v2255_v36 = vadd.f32 %v1026_v15, %v972_v53  ;;  %v1037_v53 = vld [vmem:[#allocation5 + $0x240] sm:$0x3] }
 0x410   : > { %v1039_v7 = vmul.f32 %v1037_v53, %v1034_v40  ;;  %v1122_v53 = vld [vmem:[#allocation5 + $0x2a8] sm:$0x3] }
 0x412   : > { %v1046_v37 = vpop.permute.xlu0 %1045  ;;  %v1116_v43 = vpop.permute.xlu2 %1115  ;;  %v1041_v20 = vadd.f32 %v1039_v7, %v2243_v11 }
 0x413   : > { %v1044_v33 = vpop.permute.xlu1 %1043 }
 0x414   : > { %v1048_v8 = vsel %vm1047_vm11, %v1044_v33, %v1046_v37  ;;  %v1049_v13 = vsel %vm1047_vm11, %v1046_v37, %v1044_v33 }
 0x415   : > { %v1053_v29 = vmul.f32 %v1051_v9, %v1048_v8  ;;  %v1054_v6 = vmul.f32 %v1052_v10, %v1049_v13 }
 0x41a   : > { %v1072_v35 = vpop.permute.xlu0 %1071  ;;  %v2259_v52 = vpop.permute.xlu2 %1141 }
 0x41b   : > { %v1060_v55 = vpop.permute.xlu1 %1059  ;;  %v1076_v50 = vsel %vm1075_vm12, %v1072_v35, %v1074_v5  ;;  %v1077_v21 = vsel %vm1075_vm12, %v1074_v5, %v1072_v35  ;;  %v1056_v5 = vadd.f32 %v1054_v6, %v2241_v59  ;;  %v1108_v59 = vld [vmem:[#allocation5 + $0x298] sm:$0x3] }
 0x41c   : > { %v1062_v27 = vsel %vm1061_vm13, %v1058_v19, %v1060_v55  ;;  %v1063_v51 = vsel %vm1061_vm13, %v1060_v55, %v1058_v19  ;;  %v1081_v24 = vmul.f32 %v1079_v57, %v1076_v50  ;;  %v1082_v39 = vmul.f32 %v1080_v23, %v1077_v21  ;;  %v1121_v55 = vld [vmem:[#allocation5 + $0x2a0] sm:$0x3]  ;;  %v1135_v50 = vld [vmem:[#allocation5 + $0x2b0] sm:$0x3]  ;;  %v1164_v21 = vld [vmem:[#allocation5 + $0x2d8] sm:$0x3] }
 0x41d   : > { %v1067_v15 = vmul.f32 %v1065_v22, %v1062_v27  ;;  %v1055_v19 = vadd.f32 %v1053_v29, %v2239_v17  ;;  %v1068_v11 = vmul.f32 %v1066_v49, %v1063_v51  ;;  %v1107_v17 = vld [vmem:[#allocation5 + $0x290] sm:$0x3]  ;;  %v1136_v29 = vld [vmem:[#allocation5 + $0x2b8] sm:$0x3]  ;;  %v1178_v51 = vld [vmem:[#allocation5 + $0x2e8] sm:$0x3] }
 0x41e   : > { %v1084_v9 = vadd.f32 %v1082_v39, %v2255_v36  ;;  %v1163_v23 = vld [vmem:[#allocation5 + $0x2d0] sm:$0x3] }
 0x422   : > { %v1088_v44 = vpop.permute.xlu0 %1087  ;;  %v2267_v46 = vpop.permute.xlu2 %1157 }
 0x423   : > { %v1086_v47 = vpop.permute.xlu1 %1085 }
 0x424   : > { %v1090_v31 = vsel %vm1089_vm14, %v1086_v47, %v1088_v44  ;;  %v1091_v38 = vsel %vm1089_vm14, %v1088_v44, %v1086_v47  ;;  %v2297_v47 = vadd.f32 %v1081_v24, %v2253_v28  ;;  %v1150_v28 = vld [vmem:[#allocation5 + $0x2c8] sm:$0x3] }
 0x425   : > { %v1095_v33 = vmul.f32 %v1093_v26, %v1090_v31  ;;  %v1096_v35 = vmul.f32 %v1094_v30, %v1091_v38 }
 0x427   : > { %v1097_v36 = vadd.f32 %v1095_v33, %v1041_v20  ;;  %v1098_v2 = vadd.f32 %v1096_v35, %v1042_v32  ;;  %v1205_v32 = vld [vmem:[#allocation5 + $0x300] sm:$0x3] }
 0x42a   : > { %v1114_v41 = vpop.permute.xlu0 %1113  ;;  %v2289_v37 = vpop.permute.xlu2 %1183 }
 0x42b   : > { %v1102_v25 = vpop.permute.xlu1 %1101  ;;  %v1118_v18 = vsel %vm1117_vm15, %v1114_v41, %v1116_v43  ;;  %v1119_v44 = vsel %vm1117_vm15, %v1116_v43, %v1114_v41  ;;  %v1069_v43 = vadd.f32 %v1067_v15, %v2248_v48  ;;  %v1149_v41 = vld [vmem:[#allocation5 + $0x2c0] sm:$0x3] }
 0x42c   : > { %v1104_v40 = vsel %vm1103_vm0, %v2257_v42, %v1102_v25  ;;  %v1105_v34 = vsel %vm1103_vm0, %v1102_v25, %v2257_v42  ;;  %v1070_v42 = vadd.f32 %v1068_v11, %v2250_v45  ;;  %v1123_v25 = vmul.f32 %v1121_v55, %v1118_v18  ;;  %v1191_v55 = vld [vmem:[#allocation5 + $0x2f0] sm:$0x3] }
 0x42d   : > { %v1124_v7 = vmul.f32 %v1122_v53, %v1119_v44  ;;  %v1109_v48 = vmul.f32 %v1107_v17, %v1104_v40  ;;  %v1110_v57 = vmul.f32 %v1108_v59, %v1105_v34  ;;  %v1192_v53 = vld [vmem:[#allocation5 + $0x2f8] sm:$0x3] }
 0x42e   : > { %v1125_v49 = vadd.f32 %v1123_v25, %v1069_v43 }
 0x42f   : > { %v1111_v26 = vadd.f32 %v1109_v48, %v1055_v19  ;;  %v1112_v30 = vadd.f32 %v1110_v57, %v1056_v5 }
 0x432   : > { %v2261_v14 = vpop.permute.xlu0 %1129 }
 0x433   : > { %v2263_v56 = vpop.permute.xlu1 %1127 }
 0x434   : > { %v1132_v6 = vsel %vm1131_vm1, %v2263_v56, %v2261_v14  ;;  %v1133_v45 = vsel %vm1131_vm1, %v2261_v14, %v2263_v56  ;;  %v1126_v14 = vadd.f32 %v1124_v7, %v1070_v42  ;;  %v1177_v56 = vld [vmem:[#allocation5 + $0x2e0] sm:$0x3] }
 0x435   : > { %v1137_v31 = vmul.f32 %v1135_v50, %v1132_v6  ;;  %v1138_v38 = vmul.f32 %v1136_v29, %v1133_v45 }
 0x437   : > { %v1139_v43 = vadd.f32 %v1137_v31, %v2297_v47 }
 0x43a   : > { %v2271_v12 = vpop.permute.xlu0 %1155 }
 0x43b   : > { %v1144_v16 = vpop.permute.xlu1 %1143  ;;  %v1160_v22 = vsel %vm1159_vm3, %v2271_v12, %v2267_v46  ;;  %v1161_v27 = vsel %vm1159_vm3, %v2267_v46, %v2271_v12  ;;  %v1206_v46 = vld [vmem:[#allocation5 + $0x308] sm:$0x3]  ;;  %v1200_v12 = vpop.permute.xlu2 %1199 }
 0x43c   : > { %v1146_v10 = vsel %vm1145_vm2, %v2259_v52, %v1144_v16  ;;  %v1147_v8 = vsel %vm1145_vm2, %v1144_v16, %v2259_v52  ;;  %v1165_v39 = vmul.f32 %v1163_v23, %v1160_v22  ;;  %v1166_v15 = vmul.f32 %v1164_v21, %v1161_v27 }
 0x43d   : > { %v1151_v52 = vmul.f32 %v1149_v41, %v1146_v10  ;;  %v1152_v16 = vmul.f32 %v1150_v28, %v1147_v8  ;;  %v1140_v41 = vadd.f32 %v1138_v38, %v1084_v9 }
 0x43e   : > { %v1167_v8 = vadd.f32 %v1165_v39, %v1111_v26 }
 0x43f   : > { %v1153_v11 = vadd.f32 %v1151_v52, %v1097_v36  ;;  %v1154_v33 = vadd.f32 %v1152_v16, %v1098_v2 }
 0x442   : > { %v1172_v58 = vpop.permute.xlu0 %1171 }
 0x443   : > { %v1170_v13 = vpop.permute.xlu1 %1169 }
 0x444   : > { %v1174_v20 = vsel %vm1173_vm4, %v1170_v13, %v1172_v58  ;;  %v1175_v24 = vsel %vm1173_vm4, %v1172_v58, %v1170_v13  ;;  %v1168_v13 = vadd.f32 %v1166_v15, %v1112_v30 }
 0x445   : > { %v1179_v18 = vmul.f32 %v1177_v56, %v1174_v20  ;;  %v1180_v44 = vmul.f32 %v1178_v51, %v1175_v24 }
 0x447   : > { %v1181_v7 = vadd.f32 %v1179_v18, %v1125_v49  ;;  %v1182_v36 = vadd.f32 %v1180_v44, %v1126_v14 }
 0x44a   : > { %v1198_v35 = vpop.permute.xlu0 %1197 }
 0x44b   : > { %v1202_v17 = vsel %vm1201_vm5, %v1198_v35, %v1200_v12  ;;  %v1203_v19 = vsel %vm1201_vm5, %v1200_v12, %v1198_v35  ;;  %v1186_v5 = vpop.permute.xlu1 %1185 }
 0x44c   : > { %v1207_v59 = vmul.f32 %v1205_v32, %v1202_v17  ;;  %v1208_v40 = vmul.f32 %v1206_v46, %v1203_v19  ;;  %v1188_v34 = vsel %vm1187_vm6, %v2289_v37, %v1186_v5  ;;  %v1189_v58 = vsel %vm1187_vm6, %v1186_v5, %v2289_v37 }
 0x44d   : > { %v1193_v28 = vmul.f32 %v1191_v55, %v1188_v34  ;;  %v1194_v10 = vmul.f32 %v1192_v53, %v1189_v58 }
 0x44e   : > { %v1209_v42 = vadd.f32 %v1207_v59, %v1153_v11  ;;  %v1210_v25 = vadd.f32 %v1208_v40, %v1154_v33 }
 0x44f   : > { %v1195_v2 = vadd.f32 %v1193_v28, %v1139_v43  ;;  %v1196_v48 = vadd.f32 %v1194_v10, %v1140_v41 }
 0x450   : > { %v1211_v57 = vadd.f32 %v1209_v42, %v1167_v8  ;;  %v1212_v50 = vadd.f32 %v1210_v25, %v1168_v13 }
 0x451   : > { %v1213_v29 = vadd.f32 %v1195_v2, %v1181_v7  ;;  %v1214_v6 = vadd.f32 %v1196_v48, %v1182_v36 }
 0x453   : > { %v1215_v45 = vadd.f32 %v1213_v29, %v1211_v57  ;;  %v1216_v54 = vadd.f32 %v1214_v6, %v1212_v50 }
 0x455   : > { %v1219_v37 = vrot.slane %v1215_v45, 1  ;;  %v1220_v52 = vrot.slane %v1216_v54, 1 }
 0x457   : > { %v1223_v47 = vadd.f32 %v1219_v37, %v1215_v45  ;;  %v1224_v9 = vadd.f32 %v1220_v52, %v1216_v54 }
 0x459   : > { %v1401_v16 = vmul.f32 -1.442695, %v1223_v47  ;;  %v1402_v23 = vmul.f32 -1.442695, %v1224_v9 }
 0x45b   : > { %1546 = vpow2.f32 %v1401_v16 }
 0x45c   : > { %1548 = vpow2.f32 %v1402_v23 }
 0x461   : > { %v1547_v21 = vpop.eup %1546 }
 0x462   : > { %v1549_v22 = vpop.eup %1548  ;;  %v1231_v27 = vadd.f32 1.0, %v1547_v21 }
 0x463   : > { %v1232_v49 = vadd.f32 1.0, %v1549_v22 }
 0x464   : > { %1550 = vrcp.f32 %v1231_v27  ;;  %v1244_v26 = vand.u32 2147483648, %v1231_v27  ;;  %v1242_v38 = vand.u32 2147483647, %v1231_v27  ;;  %vm1238_vm9 = vweird.f32 %v1231_v27 }
 0x465   : > { %1552 = vrcp.f32 %v1232_v49  ;;  %v1259_v32 = vand.u32 2147483648, %v1232_v49  ;;  %v1257_v12 = vand.u32 2147483647, %v1232_v49  ;;  %vm1253_vm11 = vweird.f32 %v1232_v49 }
 0x466   : > { %v1245_v15 = vor.u32 1.1754944e-38, %v1244_v26  ;;  %vm1243_vm12 = vcmp.eq.f32.partialorder %v1242_v38, 8.507059e+37 }
 0x467   : > { %v1260_v35 = vor.u32 1.1754944e-38, %v1259_v32  ;;  %vm1258_vm14 = vcmp.eq.f32.partialorder %v1257_v12, 8.507059e+37 }
 0x46a   : > { %v1551_v14 = vpop.eup %1550 }
 0x46b   : > { %v1553_v56 = vpop.eup %1552  ;;  %v1234_v51 = vmul.f32 %v1551_v14, %v1231_v27  ;;  %vm1239_vm7 = vweird.f32 %v1551_v14 }
 0x46c   : > { %v1249_v20 = vmul.f32 %v1553_v56, %v1232_v49  ;;  %vm1254_vm8 = vweird.f32 %v1553_v56  ;;  %vm1240_vm10 = vmor %vm1238_vm9, %vm1239_vm7 }
 0x46d   : > { %v1235_v24 = vsub.f32 1.0, %v1234_v51  ;;  %vm1255_vm13 = vmor %vm1253_vm11, %vm1254_vm8 }
 0x46e   : > { %v1250_v30 = vsub.f32 1.0, %v1249_v20 }
 0x46f   : > { %v1236_v31 = vmul.f32 %v1551_v14, %v1235_v24 }
 0x470   : > { %v1251_v46 = vmul.f32 %v1553_v56, %v1250_v30 }
 0x471   : > { %v1237_v39 = vadd.f32 %v1551_v14, %v1236_v31 }
 0x472   : > { %v1252_v11 = vadd.f32 %v1553_v56, %v1251_v46 }
 0x473   : > { %v1241_v33 = vsel %vm1240_vm10, %v1551_v14, %v1237_v39 }
 0x474   : > { %v1246_v55 = vsel %vm1243_vm12, %v1245_v15, %v1241_v33  ;;  %v1256_v53 = vsel %vm1255_vm13, %v1553_v56, %v1252_v11 }
 0x475   : > { %v1261_v18 = vsel %vm1258_vm14, %v1260_v35, %v1256_v53  ;;  %v1263_v44 = vperm.slane %v1246_v55, 0 }
 0x476   : > { %v1264_v17 = vperm.slane %v1261_v18, 0 }
 0x477   : > { %v1265_v19 = vmul.f32 %v1263_v44, %v1947_v3  ;;  %v1267_v5 = vmul.f32 %v1263_v44, %v1935_v60  ;;  %v1269_v34 = vmul.f32 %v1263_v44, %v1957_v0  ;;  %v1271_v60 = vmul.f32 %v1263_v44, %v1941_v62 }
 0x478   : > { %v1266_v59 = vmul.f32 %v1264_v17, %v1950_v4  ;;  %v1268_v40 = vmul.f32 %v1264_v17, %v1938_v61  ;;  %v1270_v58 = vmul.f32 %v1264_v17, %v1960_v1  ;;  %v1272_v61 = vmul.f32 %v1264_v17, %v1944_v63 }
 0x479   : > { %1273 = vst [vmem:[%s234_s25] sm:$0xff] %v1265_v19 }
 0x47a   : > { %1274 = vst [vmem:[%s234_s25 + $0x8] sm:$0xff] %v1266_v59 }
 0x47b   : > { %1275 = vst [vmem:[%s234_s25 + $0x10] sm:$0xff] %v1267_v5 }
 0x47c   : > { %1276 = vst [vmem:[%s234_s25 + $0x18] sm:$0xff] %v1268_v40 }
 0x47d   : > { %1277 = vst [vmem:[%s234_s25 + $0x20] sm:$0xff] %v1269_v34 }
 0x47e   : > { %1278 = vst [vmem:[%s234_s25 + $0x28] sm:$0xff] %v1270_v58 }
 0x47f   : > { %1279 = vst [vmem:[%s234_s25 + $0x30] sm:$0xff] %v1271_v60 }
 0x480   : > { %1280 = vst [vmem:[%s234_s25 + $0x38] sm:$0xff] %v1272_v61 }
 0x481   : > { %1641 = shalt.err (!%p1638_p10)
}
 0x482   : > { %s1740_s10 = smov 256  }
 0x483   : > { %1418 = dma.vmem_to_hbm [thread:$0]  (%p1835_p3), %s1295_s19, 1024, %s1297_s27, %s1282_s24, %s1740_s10, %s1740_s10, %s1710_s7  }
 0x484 PF: > { %s1311_s21 = sand.u32 1, %s1672_s15   ;;  %p2403_p12 = scmp.ge.s32.totalorder %s1684_s18, 2 }
 0x485   : > { %s1312_s26 = scalar_lea.sflag [#allocation4], %s1311_s21 }
 0x486   : > { %p1429_p13 = pnand %p2403_p12, %p1801_p6 }
 0x488   : > { %p1430_p0 = pneg %p1429_p13 }
 0x48a   : > { %1667 = dma.done.wait (%p1430_p0), %s1312_s26, 1024  }
 0x48b   : > { %1669 = vsyncadd (%p1430_p0), %s1312_s26, 4294966272  ;;  %p18_p5 = scmp.ge.s32.totalorder %s1819_s29, 4   ;;  %s2404_s15 = smov %s1676_s16 }
 0x48c   : > { %s2405_s16 = smov %s1680_s17  ;;  %s2406_s17 = smov %s1831_s8 }
 0x48d   : > { %s2407_s18 = smov %s1819_s29  ;;  %20 = sbr.rel (!%p18_p5) target bundleno = 6 (0x6), region = 133 }
 0x492   :  { %1318 = vsyncpa [#allocation3], 1 }
 0x493   :  { %1320 = vsyncpa [#allocation3 + $0x1], 1 }
 0x494   :  { %1321 = vsyncpa [#allocation6], 1 }
 0x495   :  { %1322 = vsyncpa [#allocation4], 1 }
 0x496   :  { %1324 = vsyncpa [#allocation4 + $0x1], 1 }

</bundles_post_ra>
